<compile_context>
chip_gen: v6e
topology: v6e:2x2x1
jax: 0.10.0
libtpu: 0.0.40
codegen_flags: <defaults>
</compile_context>

<pallas_src>
import functools

import jax
import jax.numpy as jnp
from jax import lax
from jax.experimental import pallas as pl
from jax.experimental.pallas import tpu as pltpu


def _round_up(x, m):
    return ((x + m - 1) // m) * m


def _rnn_gate_kernel(x01c_ref, w_pre_ref, w_rec_ref, w_htail_ref, out_ref,
                     *, hid_dim, seq_len):
    H, S = hid_dim, seq_len
    TB = x01c_ref.shape[0]
    LP = w_rec_ref.shape[0]          # packed gate-slab width (>= 4H, mult of 128)
    OP = out_ref.shape[1]            # lane-padded output block width

    x01c = x01c_ref[...]             # (TB, 2S+1) = [x0 | x1 | 1]
    w_rec = w_rec_ref[...]           # (LP, LP)   rows 0:H live

    # Everything that depends only on the inputs (per-step GRU input
    # projections, every bias, and the AR/gate tails) comes out of a single
    # MXU pass -> completely off the serial recurrence and off the VPU.
    pre = jnp.dot(x01c, w_pre_ref[...], preferred_element_type=jnp.float32)
    # pre layout: [GI slab step 0 | ... | GI slab step S-1 | lin+ar | gate]
    #   GI slab t (LP lanes): [x_t*w_ir+b_r | x_t*w_iz+b_z | b_hn | x_t*w_in+b_in]

    zpad = jnp.zeros((TB, LP - H), jnp.float32)   # hoisted (pads h back to LP lanes)
    h = jnp.zeros((TB, LP), jnp.float32)          # hidden state lives in lanes 0:H

    # Fully unrolled recurrence (S static & small).  Per step: one 128-wide
    # MXU pass + packed 128-lane gate math.  Per-slab offsets (static slices)
    # are handled by Mosaic's lane-shift lowering (XLU slot, which is idle).
    for t in range(S):
        p = (jnp.dot(h, w_rec, preferred_element_type=jnp.float32)
             + pre[:, t * LP:(t + 1) * LP])
        rz = jax.nn.sigmoid(p[:, 0:2 * H])                 # one EUP issue for [r|z]
        r = rz[:, 0:H]
        z = rz[:, H:2 * H]
        n = jnp.tanh(p[:, 3 * H:4 * H] + r * p[:, 2 * H:3 * H])
        h_new = n + z * (h[:, 0:H] - n)                    # == (1-z)*n + z*h
        h = jnp.concatenate([h_new, zpad], axis=1)         # back to LP lanes

    # Lane-dense fused epilogue: both tail blocks are OP(=128)-lane wide, so
    # the split and the final store are unmasked full-vreg operations.
    comb = (jnp.dot(h, w_htail_ref[...], preferred_element_type=jnp.float32)
            + pre[:, S * LP:])                             # (TB, 2*OP)
    out_ref[...] = comb[:, 0:OP] * comb[:, OP:2 * OP]


def prepare_kernel_params(params):
    """Repack PyTorch-layout params into the packed / fused kernel layout (once)."""
    H = params["w_hh"].shape[0]
    S = params["w_ar"].shape[0]
    O = params["b_lin"].shape[-1]
    LP = _round_up(4 * H, 128)   # packed gate-slab lanes: [r | z | n(h) | n(x)]
    OP = _round_up(O, 128)       # lane-padded tail block

    w_ih, b_ih = params["w_ih"], params["b_ih"]            # (1, 3H)
    w_hh, b_hh = params["w_hh"], params["b_hh"]            # (H, 3H), (1, 3H)
    g = lambda a, k: a[..., k * H:(k + 1) * H]
    w_ir, w_iz, w_in = g(w_ih, 0), g(w_ih, 1), g(w_ih, 2)
    b_ir, b_iz, b_in = g(b_ih, 0), g(b_ih, 1), g(b_ih, 2)
    w_hr, w_hz, w_hn = g(w_hh, 0), g(w_hh, 1), g(w_hh, 2)
    b_hr, b_hz, b_hn = g(b_hh, 0), g(b_hh, 1), g(b_hh, 2)

    # Recurrent weight: h lives in lanes 0:H; output column blocks are
    # [r-pre | z-pre | gh_n | 0] (the gin block is input-only).
    w_rec = jnp.zeros((LP, LP), jnp.float32)
    w_rec = w_rec.at[0:H, 0:H].set(w_hr)
    w_rec = w_rec.at[0:H, H:2 * H].set(w_hz)
    w_rec = w_rec.at[0:H, 2 * H:3 * H].set(w_hn)

    # Combined input/bias projection, consumed by ONE MXU pass in the kernel.
    # Rows: [x0 steps 0..S-1 | x1 steps 0..S-1 | constant 1].
    n_in = 2 * S + 1
    w_pre = jnp.zeros((n_in, S * LP + 2 * OP), jnp.float32)
    for t in range(S):
        c = t * LP
        w_pre = w_pre.at[t, c + 0:c + H].set(w_ir[0])
        w_pre = w_pre.at[t, c + H:c + 2 * H].set(w_iz[0])
        w_pre = w_pre.at[t, c + 3 * H:c + 4 * H].set(w_in[0])
        w_pre = w_pre.at[2 * S, c + 0:c + H].set((b_ir + b_hr)[0])
        w_pre = w_pre.at[2 * S, c + H:c + 2 * H].set((b_iz + b_hz)[0])
        w_pre = w_pre.at[2 * S, c + 2 * H:c + 3 * H].set(b_hn[0])
        w_pre = w_pre.at[2 * S, c + 3 * H:c + 4 * H].set(b_in[0])
    ct = S * LP
    w_pre = w_pre.at[0:S, ct:ct + O].set(params["w_ar"])
    w_pre = w_pre.at[S:2 * S, ct + OP:ct + OP + O].set(params["w_gate"])
    w_pre = w_pre.at[2 * S, ct:ct + O].set((params["b_lin"] + params["b_ar"])[0])
    w_pre = w_pre.at[2 * S, ct + OP:ct + OP + O].set(params["b_gate"][0])

    # h-dependent tail: rows 0:H -> [w_lin | 0], lane-padded blocks.
    w_htail = jnp.zeros((LP, 2 * OP), jnp.float32)
    w_htail = w_htail.at[0:H, 0:O].set(params["w_lin"])

    return {"w_pre": w_pre, "w_rec": w_rec, "w_htail": w_htail}


def rnn_gate_net(x, params, *, tile_b=None):
    """x: (B, S, 2) float32.  Returns (B, output_dim)."""
    B, S, F = x.shape
    assert F >= 2
    H = params["w_hh"].shape[0]
    O = params["b_lin"].shape[-1]
    LP = _round_up(4 * H, 128)
    OP = _round_up(O, 128)

    kp = prepare_kernel_params(params)

    # Pack [x0 | x1 | 1]; the trailing constant column lets every bias fold
    # into the single input-projection matmul inside the kernel.
    ones = jnp.ones((B, 1), x.dtype)
    x01c = jnp.concatenate([x[:, :, 0], x[:, :, 1], ones], axis=1)

    if tile_b is None:
        # >= 2 batch tiles whenever possible (v7x: 2 TCs, the "parallel" batch
        # axis is the only thing sharded across them); cap at 512 rows so the
        # unrolled recurrence's live temporaries stay far below v7x's 64 MiB
        # VMEM while still amortizing grid-step overhead on v6e/v5e.
        tile_b = min(512, max(8, _round_up(pl.cdiv(B, 2), 8)))
    Bp = _round_up(B, tile_b)
    if Bp != B:
        x01c = jnp.pad(x01c, ((0, Bp - B), (0, 0)))
    grid = (Bp // tile_b,)

    resident = lambda a: pl.BlockSpec(a.shape, lambda i: (0, 0))

    # Advisory cost estimate for XLA's scheduler.
    flops = (S * 2 * Bp * LP * LP                        # recurrent matmuls
             + 2 * Bp * (2 * S + 1) * (S * LP + 2 * OP)  # input projection
             + 2 * Bp * LP * 2 * OP                      # h-dependent tail
             + S * Bp * LP * 8)                          # gate elementwise (approx)
    transcendentals = S * Bp * 3 * H
    weight_bytes = 4 * (kp["w_pre"].size + kp["w_rec"].size + kp["w_htail"].size)
    bytes_accessed = 4 * (Bp * (2 * S + 1) + Bp * OP) + weight_bytes

    kernel = functools.partial(_rnn_gate_kernel, hid_dim=H, seq_len=S)

    out = pl.pallas_call(
        kernel,
        out_shape=jax.ShapeDtypeStruct((Bp, OP), jnp.float32),
        grid=grid,
        in_specs=[
            pl.BlockSpec((tile_b, 2 * S + 1), lambda i: (i, 0)),  # activations
            resident(kp["w_pre"]),                                # weights stay resident
            resident(kp["w_rec"]),
            resident(kp["w_htail"]),
        ],
        out_specs=pl.BlockSpec((tile_b, OP), lambda i: (i, 0)),   # lane-dense store
        compiler_params=pltpu.CompilerParams(
            dimension_semantics=("parallel",),
            vmem_limit_bytes=32 * 1024 * 1024),
        cost_estimate=pl.CostEstimate(
            flops=flops, transcendentals=transcendentals,
            bytes_accessed=bytes_accessed),
    )(x01c, kp["w_pre"], kp["w_rec"], kp["w_htail"])

    # NOTE: with < ~64 rows per core the kernel is latency-bound on the serial
    # recurrence; batch multiple independent sequences per call if possible.
    return out[:B, :O]


def init_params(key, seq_len, hid_dim, output_dim):
    """Deterministic synthetic parameter init (PyTorch-like shapes, transposed)."""
    ks = jax.random.split(key, 12)
    H, S, O = hid_dim, seq_len, output_dim
    u = lambda k, shape, scale: jax.random.uniform(
        k, shape, jnp.float32, minval=-scale, maxval=scale
    )
    sh = 1.0 / jnp.sqrt(H)
    ss = 1.0 / jnp.sqrt(S)
    return {
        # GRU(input=1, hidden=H): torch weight_ih_l0 is (3H, 1) -> store as (1, 3H)
        "w_ih": u(ks[0], (1, 3 * H), sh),
        "b_ih": u(ks[1], (1, 3 * H), sh),
        # torch weight_hh_l0 is (3H, H) -> store transposed as (H, 3H)
        "w_hh": u(ks[2], (H, 3 * H), sh),
        "b_hh": u(ks[3], (1, 3 * H), sh),
        # lin: Linear(H, O) -> (H, O)
        "w_lin": u(ks[4], (H, O), sh),
        "b_lin": u(ks[5], (1, O), sh),
        # ar: Linear(S, O) -> (S, O)
        "w_ar": u(ks[6], (S, O), ss),
        "b_ar": u(ks[7], (1, O), ss),
        # gate: Linear(S, O) -> (S, O)
        "w_gate": u(ks[8], (S, O), ss),
        "b_gate": u(ks[9], (1, O), ss),
    }


def reference_forward(x, params):
    """Pure-JAX reference mirroring the PyTorch module (for verification)."""
    x0 = x[:, :, 0]
    x1 = x[:, :, 1]
    B, S = x0.shape
    H = params["w_hh"].shape[0]

    def step(h, x_t):
        gi = x_t[:, None] * params["w_ih"] + params["b_ih"]
        gh = h @ params["w_hh"] + params["b_hh"]
        r = jax.nn.sigmoid(gi[:, :H] + gh[:, :H])
        z = jax.nn.sigmoid(gi[:, H:2 * H] + gh[:, H:2 * H])
        n = jnp.tanh(gi[:, 2 * H:] + r * gh[:, 2 * H:])
        h_new = (1.0 - z) * n + z * h
        return h_new, None

    h0 = jnp.zeros((B, H), jnp.float32)
    h_final, _ = lax.scan(step, h0, jnp.transpose(x0, (1, 0)))  # scan over seq

    lin_out = h_final @ params["w_lin"] + params["b_lin"]
    ar_out = x0 @ params["w_ar"] + params["b_ar"]
    gate = x1 @ params["w_gate"] + params["b_gate"]
    return (lin_out + ar_out) * gate


if __name__ == "__main__":
    seq_len, hid_dim, output_dim = 8, 32, 4
    batch = 2

    key = jax.random.PRNGKey(0)
    k_x, k_p = jax.random.split(key)

    x = jax.random.normal(k_x, (batch, seq_len, 2), dtype=jnp.float32)
    params = init_params(k_p, seq_len, hid_dim, output_dim)

    out = jax.block_until_ready(rnn_gate_net(x, params))
    ref = jax.block_until_ready(reference_forward(x, params))

    assert out.shape == (batch, output_dim)
    assert jnp.allclose(out, ref, atol=1e-4, rtol=1e-4), (out, ref)

    print("KERNEL_OK")
</pallas_src>

<mosaic_0001>
module attributes {stable_mosaic.version = 11 : i64} {
  func.func @_rnn_gate_kernel(%arg0: i32, %arg1: memref<8x17xf32, #tpu.memory_space<vmem>>, %arg2: memref<17x1280xf32, #tpu.memory_space<vmem>>, %arg3: memref<128x128xf32, #tpu.memory_space<vmem>>, %arg4: memref<128x256xf32, #tpu.memory_space<vmem>>, %arg5: memref<8x128xf32, #tpu.memory_space<vmem>>) attributes {dimension_semantics = [#tpu.dimension_semantics<parallel>], iteration_bounds = array<i64: 1>, scalar_prefetch = 0 : i64, scratch_operands = 0 : i64, tpu.core_type = #tpu.core_type<tc>, window_params = [{transform_indices = @transform_0, window_bounds = array<i64: 8, 17>}, {pipeline_mode = #tpu.pipeline_mode<synchronous>, transform_indices = @transform_1, window_bounds = array<i64: 17, 1280>}, {pipeline_mode = #tpu.pipeline_mode<synchronous>, transform_indices = @transform_2, window_bounds = array<i64: 128, 128>}, {pipeline_mode = #tpu.pipeline_mode<synchronous>, transform_indices = @transform_3, window_bounds = array<i64: 128, 256>}, {transform_indices = @transform_4, window_bounds = array<i64: 8, 128>}]} {
    %c0 = arith.constant 0 : index
    %c0_0 = arith.constant 0 : index
    %0 = vector.load %arg1[%c0, %c0_0] : memref<8x17xf32, #tpu.memory_space<vmem>>, vector<8x17xf32>
    %c0_1 = arith.constant 0 : index
    %c0_2 = arith.constant 0 : index
    %1 = vector.load %arg3[%c0_1, %c0_2] : memref<128x128xf32, #tpu.memory_space<vmem>>, vector<128x128xf32>
    %c0_3 = arith.constant 0 : index
    %c0_4 = arith.constant 0 : index
    %2 = vector.load %arg2[%c0_3, %c0_4] : memref<17x1280xf32, #tpu.memory_space<vmem>>, vector<17x1280xf32>
    %cst = arith.constant dense<0.000000e+00> : vector<8x1280xf32>
    %3 = tpu.matmul %0, %2, %cst {dimension_numbers = #tpu.dot_dimension_numbers<[1], [0], [0], [1], [0, 0, 1, 1], [], []>} : vector<8x17xf32>, vector<17x1280xf32>, vector<8x1280xf32> -> vector<8x1280xf32>
    %cst_5 = arith.constant 0.000000e+00 : f32
    %4 = vector.broadcast %cst_5 : f32 to vector<8x96xf32>
    %cst_6 = arith.constant 0.000000e+00 : f32
    %5 = vector.broadcast %cst_6 : f32 to vector<8x128xf32>
    %cst_7 = arith.constant dense<0.000000e+00> : vector<8x128xf32>
    %6 = tpu.matmul %5, %1, %cst_7 {dimension_numbers = #tpu.dot_dimension_numbers<[1], [0], [0], [1], [0, 0, 1, 1], [], []>} : vector<8x128xf32>, vector<128x128xf32>, vector<8x128xf32> -> vector<8x128xf32>
    %7 = vector.extract_strided_slice %3 {offsets = [0, 0], sizes = [8, 128], strides = [1, 1]} : vector<8x1280xf32> to vector<8x128xf32>
    %8 = arith.addf %6, %7 : vector<8x128xf32>
    %9 = vector.extract_strided_slice %8 {offsets = [0, 0], sizes = [8, 64], strides = [1, 1]} : vector<8x128xf32> to vector<8x64xf32>
    %10 = arith.negf %9 : vector<8x64xf32>
    %11 = math.exp %10 : vector<8x64xf32>
    %cst_8 = arith.constant 1.000000e+00 : f32
    %12 = vector.broadcast %cst_8 : f32 to vector<8x64xf32>
    %13 = arith.addf %12, %11 : vector<8x64xf32>
    %14 = arith.divf %12, %13 : vector<8x64xf32>
    %15 = vector.extract_strided_slice %14 {offsets = [0, 0], sizes = [8, 32], strides = [1, 1]} : vector<8x64xf32> to vector<8x32xf32>
    %16 = vector.extract_strided_slice %14 {offsets = [0, 32], sizes = [8, 32], strides = [1, 1]} : vector<8x64xf32> to vector<8x32xf32>
    %17 = vector.extract_strided_slice %8 {offsets = [0, 96], sizes = [8, 32], strides = [1, 1]} : vector<8x128xf32> to vector<8x32xf32>
    %18 = vector.extract_strided_slice %8 {offsets = [0, 64], sizes = [8, 32], strides = [1, 1]} : vector<8x128xf32> to vector<8x32xf32>
    %19 = arith.mulf %15, %18 : vector<8x32xf32>
    %20 = arith.addf %17, %19 : vector<8x32xf32>
    %21 = math.tanh %20 : vector<8x32xf32>
    %22 = vector.extract_strided_slice %5 {offsets = [0, 0], sizes = [8, 32], strides = [1, 1]} : vector<8x128xf32> to vector<8x32xf32>
    %23 = arith.subf %22, %21 : vector<8x32xf32>
    %24 = arith.mulf %16, %23 : vector<8x32xf32>
    %25 = arith.addf %21, %24 : vector<8x32xf32>
    %26 = tpu.concatenate %25, %4 in 1 : vector<8x32xf32>, vector<8x96xf32> -> vector<8x128xf32>
    %cst_9 = arith.constant dense<0.000000e+00> : vector<8x128xf32>
    %27 = tpu.matmul %26, %1, %cst_9 {dimension_numbers = #tpu.dot_dimension_numbers<[1], [0], [0], [1], [0, 0, 1, 1], [], []>} : vector<8x128xf32>, vector<128x128xf32>, vector<8x128xf32> -> vector<8x128xf32>
    %28 = vector.extract_strided_slice %3 {offsets = [0, 128], sizes = [8, 128], strides = [1, 1]} : vector<8x1280xf32> to vector<8x128xf32>
    %29 = arith.addf %27, %28 : vector<8x128xf32>
    %30 = vector.extract_strided_slice %29 {offsets = [0, 0], sizes = [8, 64], strides = [1, 1]} : vector<8x128xf32> to vector<8x64xf32>
    %31 = arith.negf %30 : vector<8x64xf32>
    %32 = math.exp %31 : vector<8x64xf32>
    %cst_10 = arith.constant 1.000000e+00 : f32
    %33 = vector.broadcast %cst_10 : f32 to vector<8x64xf32>
    %34 = arith.addf %33, %32 : vector<8x64xf32>
    %35 = arith.divf %33, %34 : vector<8x64xf32>
    %36 = vector.extract_strided_slice %35 {offsets = [0, 0], sizes = [8, 32], strides = [1, 1]} : vector<8x64xf32> to vector<8x32xf32>
    %37 = vector.extract_strided_slice %35 {offsets = [0, 32], sizes = [8, 32], strides = [1, 1]} : vector<8x64xf32> to vector<8x32xf32>
    %38 = vector.extract_strided_slice %29 {offsets = [0, 96], sizes = [8, 32], strides = [1, 1]} : vector<8x128xf32> to vector<8x32xf32>
    %39 = vector.extract_strided_slice %29 {offsets = [0, 64], sizes = [8, 32], strides = [1, 1]} : vector<8x128xf32> to vector<8x32xf32>
    %40 = arith.mulf %36, %39 : vector<8x32xf32>
    %41 = arith.addf %38, %40 : vector<8x32xf32>
    %42 = math.tanh %41 : vector<8x32xf32>
    %43 = vector.extract_strided_slice %26 {offsets = [0, 0], sizes = [8, 32], strides = [1, 1]} : vector<8x128xf32> to vector<8x32xf32>
    %44 = arith.subf %43, %42 : vector<8x32xf32>
    %45 = arith.mulf %37, %44 : vector<8x32xf32>
    %46 = arith.addf %42, %45 : vector<8x32xf32>
    %47 = tpu.concatenate %46, %4 in 1 : vector<8x32xf32>, vector<8x96xf32> -> vector<8x128xf32>
    %cst_11 = arith.constant dense<0.000000e+00> : vector<8x128xf32>
    %48 = tpu.matmul %47, %1, %cst_11 {dimension_numbers = #tpu.dot_dimension_numbers<[1], [0], [0], [1], [0, 0, 1, 1], [], []>} : vector<8x128xf32>, vector<128x128xf32>, vector<8x128xf32> -> vector<8x128xf32>
    %49 = vector.extract_strided_slice %3 {offsets = [0, 256], sizes = [8, 128], strides = [1, 1]} : vector<8x1280xf32> to vector<8x128xf32>
    %50 = arith.addf %48, %49 : vector<8x128xf32>
    %51 = vector.extract_strided_slice %50 {offsets = [0, 0], sizes = [8, 64], strides = [1, 1]} : vector<8x128xf32> to vector<8x64xf32>
    %52 = arith.negf %51 : vector<8x64xf32>
    %53 = math.exp %52 : vector<8x64xf32>
    %cst_12 = arith.constant 1.000000e+00 : f32
    %54 = vector.broadcast %cst_12 : f32 to vector<8x64xf32>
    %55 = arith.addf %54, %53 : vector<8x64xf32>
    %56 = arith.divf %54, %55 : vector<8x64xf32>
    %57 = vector.extract_strided_slice %56 {offsets = [0, 0], sizes = [8, 32], strides = [1, 1]} : vector<8x64xf32> to vector<8x32xf32>
    %58 = vector.extract_strided_slice %56 {offsets = [0, 32], sizes = [8, 32], strides = [1, 1]} : vector<8x64xf32> to vector<8x32xf32>
    %59 = vector.extract_strided_slice %50 {offsets = [0, 96], sizes = [8, 32], strides = [1, 1]} : vector<8x128xf32> to vector<8x32xf32>
    %60 = vector.extract_strided_slice %50 {offsets = [0, 64], sizes = [8, 32], strides = [1, 1]} : vector<8x128xf32> to vector<8x32xf32>
    %61 = arith.mulf %57, %60 : vector<8x32xf32>
    %62 = arith.addf %59, %61 : vector<8x32xf32>
    %63 = math.tanh %62 : vector<8x32xf32>
    %64 = vector.extract_strided_slice %47 {offsets = [0, 0], sizes = [8, 32], strides = [1, 1]} : vector<8x128xf32> to vector<8x32xf32>
    %65 = arith.subf %64, %63 : vector<8x32xf32>
    %66 = arith.mulf %58, %65 : vector<8x32xf32>
    %67 = arith.addf %63, %66 : vector<8x32xf32>
    %68 = tpu.concatenate %67, %4 in 1 : vector<8x32xf32>, vector<8x96xf32> -> vector<8x128xf32>
    %cst_13 = arith.constant dense<0.000000e+00> : vector<8x128xf32>
    %69 = tpu.matmul %68, %1, %cst_13 {dimension_numbers = #tpu.dot_dimension_numbers<[1], [0], [0], [1], [0, 0, 1, 1], [], []>} : vector<8x128xf32>, vector<128x128xf32>, vector<8x128xf32> -> vector<8x128xf32>
    %70 = vector.extract_strided_slice %3 {offsets = [0, 384], sizes = [8, 128], strides = [1, 1]} : vector<8x1280xf32> to vector<8x128xf32>
    %71 = arith.addf %69, %70 : vector<8x128xf32>
    %72 = vector.extract_strided_slice %71 {offsets = [0, 0], sizes = [8, 64], strides = [1, 1]} : vector<8x128xf32> to vector<8x64xf32>
    %73 = arith.negf %72 : vector<8x64xf32>
    %74 = math.exp %73 : vector<8x64xf32>
    %cst_14 = arith.constant 1.000000e+00 : f32
    %75 = vector.broadcast %cst_14 : f32 to vector<8x64xf32>
    %76 = arith.addf %75, %74 : vector<8x64xf32>
    %77 = arith.divf %75, %76 : vector<8x64xf32>
    %78 = vector.extract_strided_slice %77 {offsets = [0, 0], sizes = [8, 32], strides = [1, 1]} : vector<8x64xf32> to vector<8x32xf32>
    %79 = vector.extract_strided_slice %77 {offsets = [0, 32], sizes = [8, 32], strides = [1, 1]} : vector<8x64xf32> to vector<8x32xf32>
    %80 = vector.extract_strided_slice %71 {offsets = [0, 96], sizes = [8, 32], strides = [1, 1]} : vector<8x128xf32> to vector<8x32xf32>
    %81 = vector.extract_strided_slice %71 {offsets = [0, 64], sizes = [8, 32], strides = [1, 1]} : vector<8x128xf32> to vector<8x32xf32>
    %82 = arith.mulf %78, %81 : vector<8x32xf32>
    %83 = arith.addf %80, %82 : vector<8x32xf32>
    %84 = math.tanh %83 : vector<8x32xf32>
    %85 = vector.extract_strided_slice %68 {offsets = [0, 0], sizes = [8, 32], strides = [1, 1]} : vector<8x128xf32> to vector<8x32xf32>
    %86 = arith.subf %85, %84 : vector<8x32xf32>
    %87 = arith.mulf %79, %86 : vector<8x32xf32>
    %88 = arith.addf %84, %87 : vector<8x32xf32>
    %89 = tpu.concatenate %88, %4 in 1 : vector<8x32xf32>, vector<8x96xf32> -> vector<8x128xf32>
    %cst_15 = arith.constant dense<0.000000e+00> : vector<8x128xf32>
    %90 = tpu.matmul %89, %1, %cst_15 {dimension_numbers = #tpu.dot_dimension_numbers<[1], [0], [0], [1], [0, 0, 1, 1], [], []>} : vector<8x128xf32>, vector<128x128xf32>, vector<8x128xf32> -> vector<8x128xf32>
    %91 = vector.extract_strided_slice %3 {offsets = [0, 512], sizes = [8, 128], strides = [1, 1]} : vector<8x1280xf32> to vector<8x128xf32>
    %92 = arith.addf %90, %91 : vector<8x128xf32>
    %93 = vector.extract_strided_slice %92 {offsets = [0, 0], sizes = [8, 64], strides = [1, 1]} : vector<8x128xf32> to vector<8x64xf32>
    %94 = arith.negf %93 : vector<8x64xf32>
    %95 = math.exp %94 : vector<8x64xf32>
    %cst_16 = arith.constant 1.000000e+00 : f32
    %96 = vector.broadcast %cst_16 : f32 to vector<8x64xf32>
    %97 = arith.addf %96, %95 : vector<8x64xf32>
    %98 = arith.divf %96, %97 : vector<8x64xf32>
    %99 = vector.extract_strided_slice %98 {offsets = [0, 0], sizes = [8, 32], strides = [1, 1]} : vector<8x64xf32> to vector<8x32xf32>
    %100 = vector.extract_strided_slice %98 {offsets = [0, 32], sizes = [8, 32], strides = [1, 1]} : vector<8x64xf32> to vector<8x32xf32>
    %101 = vector.extract_strided_slice %92 {offsets = [0, 96], sizes = [8, 32], strides = [1, 1]} : vector<8x128xf32> to vector<8x32xf32>
    %102 = vector.extract_strided_slice %92 {offsets = [0, 64], sizes = [8, 32], strides = [1, 1]} : vector<8x128xf32> to vector<8x32xf32>
    %103 = arith.mulf %99, %102 : vector<8x32xf32>
    %104 = arith.addf %101, %103 : vector<8x32xf32>
    %105 = math.tanh %104 : vector<8x32xf32>
    %106 = vector.extract_strided_slice %89 {offsets = [0, 0], sizes = [8, 32], strides = [1, 1]} : vector<8x128xf32> to vector<8x32xf32>
    %107 = arith.subf %106, %105 : vector<8x32xf32>
    %108 = arith.mulf %100, %107 : vector<8x32xf32>
    %109 = arith.addf %105, %108 : vector<8x32xf32>
    %110 = tpu.concatenate %109, %4 in 1 : vector<8x32xf32>, vector<8x96xf32> -> vector<8x128xf32>
    %cst_17 = arith.constant dense<0.000000e+00> : vector<8x128xf32>
    %111 = tpu.matmul %110, %1, %cst_17 {dimension_numbers = #tpu.dot_dimension_numbers<[1], [0], [0], [1], [0, 0, 1, 1], [], []>} : vector<8x128xf32>, vector<128x128xf32>, vector<8x128xf32> -> vector<8x128xf32>
    %112 = vector.extract_strided_slice %3 {offsets = [0, 640], sizes = [8, 128], strides = [1, 1]} : vector<8x1280xf32> to vector<8x128xf32>
    %113 = arith.addf %111, %112 : vector<8x128xf32>
    %114 = vector.extract_strided_slice %113 {offsets = [0, 0], sizes = [8, 64], strides = [1, 1]} : vector<8x128xf32> to vector<8x64xf32>
    %115 = arith.negf %114 : vector<8x64xf32>
    %116 = math.exp %115 : vector<8x64xf32>
    %cst_18 = arith.constant 1.000000e+00 : f32
    %117 = vector.broadcast %cst_18 : f32 to vector<8x64xf32>
    %118 = arith.addf %117, %116 : vector<8x64xf32>
    %119 = arith.divf %117, %118 : vector<8x64xf32>
    %120 = vector.extract_strided_slice %119 {offsets = [0, 0], sizes = [8, 32], strides = [1, 1]} : vector<8x64xf32> to vector<8x32xf32>
    %121 = vector.extract_strided_slice %119 {offsets = [0, 32], sizes = [8, 32], strides = [1, 1]} : vector<8x64xf32> to vector<8x32xf32>
    %122 = vector.extract_strided_slice %113 {offsets = [0, 96], sizes = [8, 32], strides = [1, 1]} : vector<8x128xf32> to vector<8x32xf32>
    %123 = vector.extract_strided_slice %113 {offsets = [0, 64], sizes = [8, 32], strides = [1, 1]} : vector<8x128xf32> to vector<8x32xf32>
    %124 = arith.mulf %120, %123 : vector<8x32xf32>
    %125 = arith.addf %122, %124 : vector<8x32xf32>
    %126 = math.tanh %125 : vector<8x32xf32>
    %127 = vector.extract_strided_slice %110 {offsets = [0, 0], sizes = [8, 32], strides = [1, 1]} : vector<8x128xf32> to vector<8x32xf32>
    %128 = arith.subf %127, %126 : vector<8x32xf32>
    %129 = arith.mulf %121, %128 : vector<8x32xf32>
    %130 = arith.addf %126, %129 : vector<8x32xf32>
    %131 = tpu.concatenate %130, %4 in 1 : vector<8x32xf32>, vector<8x96xf32> -> vector<8x128xf32>
    %cst_19 = arith.constant dense<0.000000e+00> : vector<8x128xf32>
    %132 = tpu.matmul %131, %1, %cst_19 {dimension_numbers = #tpu.dot_dimension_numbers<[1], [0], [0], [1], [0, 0, 1, 1], [], []>} : vector<8x128xf32>, vector<128x128xf32>, vector<8x128xf32> -> vector<8x128xf32>
    %133 = vector.extract_strided_slice %3 {offsets = [0, 768], sizes = [8, 128], strides = [1, 1]} : vector<8x1280xf32> to vector<8x128xf32>
    %134 = arith.addf %132, %133 : vector<8x128xf32>
    %135 = vector.extract_strided_slice %134 {offsets = [0, 0], sizes = [8, 64], strides = [1, 1]} : vector<8x128xf32> to vector<8x64xf32>
    %136 = arith.negf %135 : vector<8x64xf32>
    %137 = math.exp %136 : vector<8x64xf32>
    %cst_20 = arith.constant 1.000000e+00 : f32
    %138 = vector.broadcast %cst_20 : f32 to vector<8x64xf32>
    %139 = arith.addf %138, %137 : vector<8x64xf32>
    %140 = arith.divf %138, %139 : vector<8x64xf32>
    %141 = vector.extract_strided_slice %140 {offsets = [0, 0], sizes = [8, 32], strides = [1, 1]} : vector<8x64xf32> to vector<8x32xf32>
    %142 = vector.extract_strided_slice %140 {offsets = [0, 32], sizes = [8, 32], strides = [1, 1]} : vector<8x64xf32> to vector<8x32xf32>
    %143 = vector.extract_strided_slice %134 {offsets = [0, 96], sizes = [8, 32], strides = [1, 1]} : vector<8x128xf32> to vector<8x32xf32>
    %144 = vector.extract_strided_slice %134 {offsets = [0, 64], sizes = [8, 32], strides = [1, 1]} : vector<8x128xf32> to vector<8x32xf32>
    %145 = arith.mulf %141, %144 : vector<8x32xf32>
    %146 = arith.addf %143, %145 : vector<8x32xf32>
    %147 = math.tanh %146 : vector<8x32xf32>
    %148 = vector.extract_strided_slice %131 {offsets = [0, 0], sizes = [8, 32], strides = [1, 1]} : vector<8x128xf32> to vector<8x32xf32>
    %149 = arith.subf %148, %147 : vector<8x32xf32>
    %150 = arith.mulf %142, %149 : vector<8x32xf32>
    %151 = arith.addf %147, %150 : vector<8x32xf32>
    %152 = tpu.concatenate %151, %4 in 1 : vector<8x32xf32>, vector<8x96xf32> -> vector<8x128xf32>
    %cst_21 = arith.constant dense<0.000000e+00> : vector<8x128xf32>
    %153 = tpu.matmul %152, %1, %cst_21 {dimension_numbers = #tpu.dot_dimension_numbers<[1], [0], [0], [1], [0, 0, 1, 1], [], []>} : vector<8x128xf32>, vector<128x128xf32>, vector<8x128xf32> -> vector<8x128xf32>
    %154 = vector.extract_strided_slice %3 {offsets = [0, 896], sizes = [8, 128], strides = [1, 1]} : vector<8x1280xf32> to vector<8x128xf32>
    %155 = arith.addf %153, %154 : vector<8x128xf32>
    %156 = vector.extract_strided_slice %155 {offsets = [0, 0], sizes = [8, 64], strides = [1, 1]} : vector<8x128xf32> to vector<8x64xf32>
    %157 = arith.negf %156 : vector<8x64xf32>
    %158 = math.exp %157 : vector<8x64xf32>
    %cst_22 = arith.constant 1.000000e+00 : f32
    %159 = vector.broadcast %cst_22 : f32 to vector<8x64xf32>
    %160 = arith.addf %159, %158 : vector<8x64xf32>
    %161 = arith.divf %159, %160 : vector<8x64xf32>
    %162 = vector.extract_strided_slice %161 {offsets = [0, 0], sizes = [8, 32], strides = [1, 1]} : vector<8x64xf32> to vector<8x32xf32>
    %163 = vector.extract_strided_slice %161 {offsets = [0, 32], sizes = [8, 32], strides = [1, 1]} : vector<8x64xf32> to vector<8x32xf32>
    %164 = vector.extract_strided_slice %155 {offsets = [0, 96], sizes = [8, 32], strides = [1, 1]} : vector<8x128xf32> to vector<8x32xf32>
    %165 = vector.extract_strided_slice %155 {offsets = [0, 64], sizes = [8, 32], strides = [1, 1]} : vector<8x128xf32> to vector<8x32xf32>
    %166 = arith.mulf %162, %165 : vector<8x32xf32>
    %167 = arith.addf %164, %166 : vector<8x32xf32>
    %168 = math.tanh %167 : vector<8x32xf32>
    %169 = vector.extract_strided_slice %152 {offsets = [0, 0], sizes = [8, 32], strides = [1, 1]} : vector<8x128xf32> to vector<8x32xf32>
    %170 = arith.subf %169, %168 : vector<8x32xf32>
    %171 = arith.mulf %163, %170 : vector<8x32xf32>
    %172 = arith.addf %168, %171 : vector<8x32xf32>
    %173 = tpu.concatenate %172, %4 in 1 : vector<8x32xf32>, vector<8x96xf32> -> vector<8x128xf32>
    %c0_23 = arith.constant 0 : index
    %c0_24 = arith.constant 0 : index
    %174 = vector.load %arg4[%c0_23, %c0_24] : memref<128x256xf32, #tpu.memory_space<vmem>>, vector<128x256xf32>
    %cst_25 = arith.constant dense<0.000000e+00> : vector<8x256xf32>
    %175 = tpu.matmul %173, %174, %cst_25 {dimension_numbers = #tpu.dot_dimension_numbers<[1], [0], [0], [1], [0, 0, 1, 1], [], []>} : vector<8x128xf32>, vector<128x256xf32>, vector<8x256xf32> -> vector<8x256xf32>
    %176 = vector.extract_strided_slice %3 {offsets = [0, 1024], sizes = [8, 256], strides = [1, 1]} : vector<8x1280xf32> to vector<8x256xf32>
    %177 = arith.addf %175, %176 : vector<8x256xf32>
    %178 = vector.extract_strided_slice %177 {offsets = [0, 0], sizes = [8, 128], strides = [1, 1]} : vector<8x256xf32> to vector<8x128xf32>
    %179 = vector.extract_strided_slice %177 {offsets = [0, 128], sizes = [8, 128], strides = [1, 1]} : vector<8x256xf32> to vector<8x128xf32>
    %180 = arith.mulf %178, %179 : vector<8x128xf32>
    %c0_26 = arith.constant 0 : index
    %c0_27 = arith.constant 0 : index
    %181 = vector.load %arg5[%c0_26, %c0_27] : memref<8x128xf32, #tpu.memory_space<vmem>>, vector<8x128xf32>
    tpu.vector_store %arg5[%c0_26, %c0_27], %180 {strides = array<i32>} : memref<8x128xf32, #tpu.memory_space<vmem>>, vector<8x128xf32>,
    return
  }
  func.func @transform_0(%arg0: i32) -> (i32, i32) {
    %c0_i32 = arith.constant 0 : i32
    %c0_i32_0 = arith.constant 0 : i32
    return %arg0, %c0_i32 : i32, i32
  }
  func.func @transform_1(%arg0: i32) -> (i32, i32) {
    %c0_i32 = arith.constant 0 : i32
    %c0_i32_0 = arith.constant 0 : i32
    %c0_i32_1 = arith.constant 0 : i32
    return %c0_i32, %c0_i32_0 : i32, i32
  }
  func.func @transform_2(%arg0: i32) -> (i32, i32) {
    %c0_i32 = arith.constant 0 : i32
    %c0_i32_0 = arith.constant 0 : i32
    %c0_i32_1 = arith.constant 0 : i32
    return %c0_i32, %c0_i32_0 : i32, i32
  }
  func.func @transform_3(%arg0: i32) -> (i32, i32) {
    %c0_i32 = arith.constant 0 : i32
    %c0_i32_0 = arith.constant 0 : i32
    %c0_i32_1 = arith.constant 0 : i32
    return %c0_i32, %c0_i32_0 : i32, i32
  }
  func.func @transform_4(%arg0: i32) -> (i32, i32) {
    %c0_i32 = arith.constant 0 : i32
    %c0_i32_0 = arith.constant 0 : i32
    return %arg0, %c0_i32 : i32, i32
  }
}

</mosaic_0001>

<bundles_post_ra>
// kernel: tpu_custom_call.1
= control target key start
LH: loop header
LB: loop body
LE: loop exit
PB: predicated region body
PF: predicated region fallthrough
CT: control target
= control target key end

     0   :  { %9 = vsyncpa [#allocation3], 0  ;;  %s2585_s0 = inlined_call_operand.hbm [shape: f32[8,17], index: 0, kind: input, shape index: {}]   ;;  %s2586_s1 = inlined_call_operand.hbm [shape: f32[17,1280], index: 1, kind: input, shape index: {}]   ;;  %s2587_s2 = inlined_call_operand.hbm [shape: f32[128,128], index: 2, kind: input, shape index: {}]   ;;  %s2588_s3 = inlined_call_operand.hbm [shape: f32[128,256], index: 3, kind: input, shape index: {}]   ;;  %s2589_s4 = inlined_call_operand.hbm [shape: f32[8,128], index: 4, kind: output, shape index: {}]  }
   0x1   :  { %10 = vsyncpa [#allocation6], 0 }
   0x2   :  { %11 = vsyncpa [#allocation9], 0 }
   0x3   :  { %12 = vsyncpa [#allocation4], 0  ;;  %s2102_s15 = smov [#allocation5]  }
   0x4   :  { %s28_s16 = sshll.u32 %s2102_s15, 4  ;;  %s29_s16 = int_to_ptr.vmem [resolvable:$true] %s28_s16 }
   0x5   :  { %s2002_s17 = scalar_lea.vmem %s29_s16, 3840  ;;  %p2007_p1 = scmp.lt.s32.totalorder %s29_s16, %s29_s16 }
   0x6   :  { %p2003_p0 = scmp.ne.s32.totalorder %s29_s16, %s2002_s17  ;;  %p2008_p2 = scmp.lt.s32.totalorder %s2002_s17, %s2002_s17 }
   0x8   :  { %p2009_p3 = por %p2008_p2, %p2007_p1 }
   0xa   :  { %p2010_p4 = pnand %p2009_p3, %p2003_p0 }
   0xc   :  { %2013 = shalt.err (!%p2010_p4)
}
   0xd   :  { %s2103_s18 = smov 1280   ;;  %s2104_s19 = smov 80  }
   0xe   :  { %34 = dma.hbm_to_vmem [thread:$0]  %s2586_s1, 3840, %s29_s16, [#allocation6], %s2103_s18, %s2103_s18, %s2104_s19  }
   0xf   :  { %s2105_s22 = smov [#allocation2]   ;;  %s2106_s24 = smov [#allocation7]  }
  0x10   :  { %s19_s23 = sshll.u32 %s2105_s22, 4  ;;  %s40_s25 = sshll.u32 %s2106_s24, 4  ;;  %s20_s23 = int_to_ptr.vmem [resolvable:$true] %s19_s23  ;;  %s41_s25 = int_to_ptr.vmem [resolvable:$true] %s40_s25 }
  0x11   :  { %s2022_s26 = scalar_lea.vmem %s20_s23, 128  ;;  %p2027_p6 = scmp.lt.s32.totalorder %s20_s23, %s20_s23 }
  0x12   :  { %p2023_p5 = scmp.ne.s32.totalorder %s20_s23, %s2022_s26  ;;  %p2028_p7 = scmp.lt.s32.totalorder %s2022_s26, %s2022_s26 }
  0x14   :  { %p2029_p8 = por %p2028_p7, %p2027_p6 }
  0x16   :  { %p2030_p9 = pnand %p2029_p8, %p2023_p5 }
  0x18   :  { %2033 = shalt.err (!%p2030_p9)
}
  0x19   :  { %22 = dma.hbm_to_vmem [thread:$0]  %s2585_s0, 128, %s20_s23, [#allocation3]  }
  0x1a   :  { %s2042_s29 = scalar_lea.vmem %s41_s25, 2048  ;;  %p2047_p11 = scmp.lt.s32.totalorder %s41_s25, %s41_s25 }
  0x1b   :  { %p2043_p10 = scmp.ne.s32.totalorder %s41_s25, %s2042_s29  ;;  %p2048_p12 = scmp.lt.s32.totalorder %s2042_s29, %s2042_s29 }
  0x1d   :  { %p2049_p13 = por %p2048_p12, %p2047_p11 }
  0x1f   :  { %p2050_p0 = pnand %p2049_p13, %p2043_p10 }
  0x21   :  { %2053 = shalt.err (!%p2050_p0)
}
  0x22   :  { %s2107_s1 = smov 128   ;;  %s2108_s30 = smov 8  }
  0x23   :  { %46 = dma.hbm_to_vmem [thread:$0]  %s2587_s2, 2048, %s41_s25, [#allocation6], %s2107_s1, %s2107_s1, %s2108_s30  }
  0x24   :  { %s2109_s7 = smov [#allocation8]  }
  0x25   :  { %s52_s8 = sshll.u32 %s2109_s7, 4  ;;  %s53_s8 = int_to_ptr.vmem [resolvable:$true] %s52_s8 }
  0x26   :  { %s2062_s9 = scalar_lea.vmem %s53_s8, 4096  ;;  %p2067_p2 = scmp.lt.s32.totalorder %s53_s8, %s53_s8 }
  0x27   :  { %p2063_p1 = scmp.ne.s32.totalorder %s53_s8, %s2062_s9  ;;  %p2068_p3 = scmp.lt.s32.totalorder %s2062_s9, %s2062_s9 }
  0x29   :  { %p2069_p4 = por %p2068_p3, %p2067_p2 }
  0x2b   :  { %p2070_p5 = pnand %p2069_p4, %p2063_p1 }
  0x2d   :  { %2073 = shalt.err (!%p2070_p5)
}
  0x2e   :  { %s2110_s0 = smov 256   ;;  %s2111_s10 = smov 16  }
  0x2f   :  { %58 = dma.hbm_to_vmem [thread:$0]  %s2588_s3, 4096, %s53_s8, [#allocation9], %s2110_s0, %s2110_s0, %s2111_s10  }
  0x30   :  { %2094 = dma.done.wait [#allocation3], 128  }
  0x31   :  { %2095 = vsyncadd [#allocation3], 4294967168 }
  0x32   :  { %2096 = dma.done.wait [#allocation6], 5888  }
  0x33   :  { %2097 = vsyncadd [#allocation6], 4294961408 }
  0x34   :  { %2098 = dma.done.wait [#allocation9], 4096  }
  0x35   :  { %2099 = vsyncadd [#allocation9], 4294963200  ;;  %v2112_v0 = vmov 0.0   ;;  %vm2113_vm0 = vmmov 0   ;;  %v2159_v1 = vld [vmem:[#allocation7 + $0x78] sm:$0xff]  ;;  %v2161_v2 = vld [vmem:[#allocation7 + $0x70] sm:$0xff] }
  0x36   :  { %1650 = vmatprep.subr.mxu1 %v2112_v0  ;;  %217 = vmatprep.mubr.f32.mxu0 %v2112_v0  ;;  %v2165_v3 = vld [vmem:[#allocation7 + $0x68] sm:$0xff]  ;;  %vm122_vm1 = vcmask 1040384   ;;  %v2169_v4 = vld [vmem:[#allocation7 + $0x60] sm:$0xff]  ;;  %v109_v5 = vld [vmem:[#allocation5 + $0xa8] sm:$0x1]  ;;  %vm118_vm2 = vcmask 138240  }
  0x37   :  { %1682 = vmatprep.mubr.msk.f32.mxu1 %vm2113_vm0, %v2112_v0  ;;  %1651 = vmatpush3.msra.mxu1 %v2159_v1  ;;  %v108_v6 = vld [vmem:[#allocation5 + $0xa0] sm:$0x1]  ;;  %v99_v7 = vld [vmem:[#allocation5 + $0x58] sm:$0xff]  ;;  %v98_v8 = vld [vmem:[#allocation5 + $0x50] sm:$0xff]  ;;  %s2114_s2 = smov 64   ;;  %s2115_s3 = smov 96  }
  0x38   :  { %1652 = vmatprep.subr.mxu1 %v2112_v0  ;;  %1483 = vmatprep.subr.msk.mxu0 %vm122_vm1, %v109_v5  ;;  %v2174_v9 = vld [vmem:[#allocation7 + $0x58] sm:$0xff]  ;;  %v88_v11 = vld [vmem:[#allocation5] sm:$0xff]  ;;  %v2181_v13 = vld [vmem:[#allocation2] sm:$0xff]  ;;  %s2116_s13 = smov 32   ;;  %vm610_vm3 = vcmask 261120   ;;  %s2117_s14 = smov [#allocation10]  }
  0x39   :  { %1653 = vmatpush3.msra.mxu1 %v2161_v2  ;;  %1484 = vmatpush1.msk.msra.mxu0 %vm122_vm1, %v108_v6  ;;  %v89_v10 = vld [vmem:[#allocation5 + $0x8] sm:$0xff]  ;;  %v2179_v12 = vld [vmem:[#allocation7 + $0x50] sm:$0xff]  ;;  %v2185_v14 = vld [vmem:[#allocation7 + $0x48] sm:$0xff]  ;;  %s1472_s15 = sshll.u32 %s2117_s14, 4  ;;  %s1473_s15 = int_to_ptr.vmem [resolvable:$true] %s1472_s15 }
  0x3a   :  { %1654 = vmatprep.subr.mxu1 %v2112_v0  ;;  %181 = vmatprep.subr.mxu0 %v99_v7  ;;  %v2191_v15 = vld [vmem:[#allocation7 + $0x40] sm:$0xff]  ;;  %v2196_v16 = vld [vmem:[#allocation7 + $0x38] sm:$0xff]  ;;  %v2200_v17 = vld [vmem:[#allocation7 + $0x30] sm:$0xff]  ;;  %s2074_s16 = scalar_lea.vmem %s1473_s15, 128  ;;  %p2079_p7 = scmp.lt.s32.totalorder %s1473_s15, %s1473_s15 }
  0x3b   :  { %1655 = vmatpush3.msra.mxu1 %v2165_v3  ;;  %182 = vmatpush1.msra.mxu0 %v98_v8  ;;  %v2204_v18 = vld [vmem:[#allocation7 + $0x28] sm:$0xff]  ;;  %v2208_v19 = vld [vmem:[#allocation7 + $0x20] sm:$0xff]  ;;  %v2212_v20 = vld [vmem:[#allocation7 + $0x18] sm:$0xff]  ;;  %p2075_p6 = scmp.ne.s32.totalorder %s1473_s15, %s2074_s16  ;;  %p2080_p8 = scmp.lt.s32.totalorder %s2074_s16, %s2074_s16 }
  0x3c   :  { %1656 = vmatprep.subr.mxu1 %v2112_v0  ;;  %183 = vmatprep.subr.mxu0 %v89_v10  ;;  %v2216_v21 = vld [vmem:[#allocation7 + $0x10] sm:$0xff]  ;;  %v2220_v22 = vld [vmem:[#allocation7 + $0x8] sm:$0xff]  ;;  %v2224_v23 = vld [vmem:[#allocation7] sm:$0xff] }
  0x3d   :  { %1657 = vmatpush3.msra.mxu1 %v2169_v4  ;;  %184 = vmatpush1.msra.mxu0 %v88_v11  ;;  %v111_v38 = vld [vmem:[#allocation5 + $0xb8] sm:$0x1]  ;;  %v110_v39 = vld [vmem:[#allocation5 + $0xb0] sm:$0x1]  ;;  %v101_v40 = vld [vmem:[#allocation5 + $0x68] sm:$0xff]  ;;  %p2081_p9 = por %p2080_p8, %p2079_p7 }
  0x3e   :  { %1658 = vmatprep.subr.mxu1 %v2112_v0  ;;  %1485 = vmatmul.mubr.msk.f32.vlgmr.msra.gmra.mxu0 %vm118_vm2, %v2181_v13  ;;  %v100_v41 = vld [vmem:[#allocation5 + $0x60] sm:$0xff]  ;;  %v91_v42 = vld [vmem:[#allocation5 + $0x18] sm:$0xff]  ;;  %v90_v43 = vld [vmem:[#allocation5 + $0x10] sm:$0xff] }
  0x3f   :  { %1659 = vmatpush3.msra.mxu1 %v2174_v9  ;;  %288 = vmatprep.mubr.f32.mxu0 %v2112_v0  ;;  %v113_v44 = vld [vmem:[#allocation5 + $0xc8] sm:$0x1]  ;;  %v112_v45 = vld [vmem:[#allocation5 + $0xc0] sm:$0x1]  ;;  %v103_v46 = vld [vmem:[#allocation5 + $0x78] sm:$0xff]  ;;  %p2082_p10 = pnand %p2081_p9, %p2075_p6 }
  0x40   :  { %1660 = vmatprep.subr.mxu1 %v2112_v0  ;;  %1486 = vmatprep.subr.msk.mxu0 %vm122_vm1, %v111_v38  ;;  %v102_v47 = vld [vmem:[#allocation5 + $0x70] sm:$0xff]  ;;  %v93_v49 = vld [vmem:[#allocation5 + $0x28] sm:$0xff]  ;;  %v92_v51 = vld [vmem:[#allocation5 + $0x20] sm:$0xff] }
  0x41   :  { %1661 = vmatpush3.msra.mxu1 %v2179_v12  ;;  %1487 = vmatpush1.msk.msra.mxu0 %vm122_vm1, %v110_v39  ;;  %v115_v52 = vld [vmem:[#allocation5 + $0xd8] sm:$0x1]  ;;  %v114_v53 = vld [vmem:[#allocation5 + $0xd0] sm:$0x1]  ;;  %v105_v54 = vld [vmem:[#allocation5 + $0x88] sm:$0xff] }
  0x42   :  { %1662 = vmatprep.subr.mxu1 %v2112_v0  ;;  %252 = vmatprep.subr.mxu0 %v101_v40  ;;  %v104_v55 = vld [vmem:[#allocation5 + $0x80] sm:$0xff]  ;;  %v95_v56 = vld [vmem:[#allocation5 + $0x38] sm:$0xff]  ;;  %v94_v57 = vld [vmem:[#allocation5 + $0x30] sm:$0xff] }
  0x43   :  { %1663 = vmatpush3.msra.mxu1 %v2185_v14  ;;  %253 = vmatpush1.msra.mxu0 %v100_v41  ;;  %v117_v58 = vld [vmem:[#allocation5 + $0xe8] sm:$0x1]  ;;  %v116_v59 = vld [vmem:[#allocation5 + $0xe0] sm:$0x1]  ;;  %v107_v60 = vld [vmem:[#allocation5 + $0x98] sm:$0xff] }
  0x44   :  { %1664 = vmatprep.subr.mxu1 %v2112_v0  ;;  %254 = vmatprep.subr.mxu0 %v91_v42  ;;  %v106_v61 = vld [vmem:[#allocation5 + $0x90] sm:$0xff]  ;;  %v97_v62 = vld [vmem:[#allocation5 + $0x48] sm:$0xff]  ;;  %v96_v63 = vld [vmem:[#allocation5 + $0x40] sm:$0xff] }
  0x45   :  { %1665 = vmatpush3.msra.mxu1 %v2191_v15  ;;  %255 = vmatpush1.msra.mxu0 %v90_v43 }
  0x46   :  { %1666 = vmatprep.subr.mxu1 %v2112_v0  ;;  %1488 = vmatmul.mubr.msk.f32.vlgmr.msra.gmra.mxu0 %vm118_vm2, %v2181_v13 }
  0x47   :  { %1667 = vmatpush3.msra.mxu1 %v2196_v16  ;;  %1489 = vmatprep.subr.msk.mxu0 %vm122_vm1, %v113_v44 }
  0x48   :  { %1668 = vmatprep.subr.mxu1 %v2112_v0  ;;  %1490 = vmatpush1.msk.msra.mxu0 %vm122_vm1, %v112_v45 }
  0x49   :  { %1669 = vmatpush3.msra.mxu1 %v2200_v17  ;;  %359 = vmatprep.mubr.f32.mxu0 %v2112_v0 }
  0x4a   :  { %1670 = vmatprep.subr.mxu1 %v2112_v0  ;;  %323 = vmatprep.subr.mxu0 %v103_v46 }
  0x4b   :  { %1671 = vmatpush3.msra.mxu1 %v2204_v18  ;;  %324 = vmatpush1.msra.mxu0 %v102_v47 }
  0x4c   :  { %1672 = vmatprep.subr.mxu1 %v2112_v0  ;;  %325 = vmatprep.subr.mxu0 %v93_v49 }
  0x4d   :  { %1673 = vmatpush3.msra.mxu1 %v2208_v19  ;;  %326 = vmatpush1.msra.mxu0 %v92_v51 }
  0x4e   :  { %1674 = vmatprep.subr.mxu1 %v2112_v0  ;;  %1491 = vmatmul.mubr.msk.f32.vlgmr.msra.gmra.mxu0 %vm118_vm2, %v2181_v13 }
  0x4f   :  { %1675 = vmatpush3.msra.mxu1 %v2212_v20  ;;  %1492 = vmatprep.subr.msk.mxu0 %vm122_vm1, %v115_v52 }
  0x50   :  { %1676 = vmatprep.subr.mxu1 %v2112_v0  ;;  %1493 = vmatpush1.msk.msra.mxu0 %vm122_vm1, %v114_v53 }
  0x51   :  { %1677 = vmatpush3.msra.mxu1 %v2216_v21  ;;  %430 = vmatprep.mubr.f32.mxu0 %v2112_v0 }
  0x52   :  { %1678 = vmatprep.subr.mxu1 %v2112_v0  ;;  %394 = vmatprep.subr.mxu0 %v105_v54 }
  0x53   :  { %1679 = vmatpush3.msra.mxu1 %v2220_v22  ;;  %395 = vmatpush1.msra.mxu0 %v104_v55 }
  0x54   :  { %1680 = vmatprep.subr.mxu1 %v2112_v0  ;;  %396 = vmatprep.subr.mxu0 %v95_v56 }
  0x55   :  { %1681 = vmatpush3.msra.mxu1 %v2224_v23  ;;  %397 = vmatpush1.msra.mxu0 %v94_v57 }
  0x56   :  { %1683 = vmatmul.mubr.f32.vlgmr.msra.gmra.mxu1 %v2112_v0  ;;  %1720 = vmatprep.subr.mxu1 %v2112_v0 }
  0x57   :  { %1721 = vmatpush3.msra.mxu1 %v2159_v1  ;;  %1752 = vmatprep.mubr.msk.f32.mxu1 %vm2113_vm0, %v2112_v0 }
  0x58   :  { %1722 = vmatprep.subr.mxu1 %v2112_v0  ;;  %1494 = vmatmul.mubr.msk.f32.vlgmr.msra.gmra.mxu0 %vm118_vm2, %v2181_v13 }
  0x59   :  { %1723 = vmatpush3.msra.mxu1 %v2161_v2  ;;  %1495 = vmatprep.subr.msk.mxu0 %vm122_vm1, %v117_v58 }
  0x5a   :  { %1724 = vmatprep.subr.mxu1 %v2112_v0  ;;  %1496 = vmatpush1.msk.msra.mxu0 %vm122_vm1, %v116_v59 }
  0x5b   :  { %1725 = vmatpush3.msra.mxu1 %v2165_v3  ;;  %501 = vmatprep.mubr.f32.mxu0 %v2112_v0 }
  0x5c   :  { %1726 = vmatprep.subr.mxu1 %v2112_v0  ;;  %465 = vmatprep.subr.mxu0 %v107_v60 }
  0x5d   :  { %1727 = vmatpush3.msra.mxu1 %v2169_v4  ;;  %466 = vmatpush1.msra.mxu0 %v106_v61 }
  0x5e   :  { %1728 = vmatprep.subr.mxu1 %v2112_v0  ;;  %467 = vmatprep.subr.mxu0 %v97_v62 }
  0x5f   :  { %1729 = vmatpush3.msra.mxu1 %v2174_v9  ;;  %468 = vmatpush1.msra.mxu0 %v96_v63 }
  0x60   :  { %1730 = vmatprep.subr.mxu1 %v2112_v0  ;;  %1497 = vmatmul.mubr.msk.f32.vlgmr.msra.gmra.mxu0 %vm118_vm2, %v2181_v13 }
  0x61   :  { %1731 = vmatpush3.msra.mxu1 %v2179_v12  ;;  %1685 = vmatprep.subr.mxu0 %v2112_v0 }
  0x62   :  { %1732 = vmatprep.subr.mxu1 %v2112_v0  ;;  %1686 = vmatpush3.msra.mxu0 %v2159_v1 }
  0x63   :  { %1733 = vmatpush3.msra.mxu1 %v2185_v14  ;;  %1717 = vmatprep.mubr.msk.f32.mxu0 %vm2113_vm0, %v2112_v0 }
  0x64   :  { %1734 = vmatprep.subr.mxu1 %v2112_v0  ;;  %1687 = vmatprep.subr.mxu0 %v2112_v0 }
  0x65   :  { %1735 = vmatpush3.msra.mxu1 %v2191_v15  ;;  %1688 = vmatpush3.msra.mxu0 %v2161_v2 }
  0x66   :  { %1736 = vmatprep.subr.mxu1 %v2112_v0  ;;  %1689 = vmatprep.subr.mxu0 %v2112_v0 }
  0x67   :  { %1737 = vmatpush3.msra.mxu1 %v2196_v16  ;;  %1690 = vmatpush3.msra.mxu0 %v2165_v3 }
  0x68   :  { %1738 = vmatprep.subr.mxu1 %v2112_v0  ;;  %1691 = vmatprep.subr.mxu0 %v2112_v0 }
  0x69   :  { %1739 = vmatpush3.msra.mxu1 %v2200_v17  ;;  %1692 = vmatpush3.msra.mxu0 %v2169_v4 }
  0x6a   :  { %1740 = vmatprep.subr.mxu1 %v2112_v0  ;;  %1693 = vmatprep.subr.mxu0 %v2112_v0 }
  0x6b   :  { %1741 = vmatpush3.msra.mxu1 %v2204_v18  ;;  %1694 = vmatpush3.msra.mxu0 %v2174_v9 }
  0x6c   :  { %1742 = vmatprep.subr.mxu1 %v2112_v0  ;;  %1695 = vmatprep.subr.mxu0 %v2112_v0 }
  0x6d   :  { %1743 = vmatpush3.msra.mxu1 %v2208_v19  ;;  %1696 = vmatpush3.msra.mxu0 %v2179_v12 }
  0x6e   :  { %1744 = vmatprep.subr.mxu1 %v2112_v0  ;;  %1697 = vmatprep.subr.mxu0 %v2112_v0 }
  0x6f   :  { %1745 = vmatpush3.msra.mxu1 %v2212_v20  ;;  %1698 = vmatpush3.msra.mxu0 %v2185_v14 }
  0x70   :  { %1746 = vmatprep.subr.mxu1 %v2112_v0  ;;  %1699 = vmatprep.subr.mxu0 %v2112_v0 }
  0x71   :  { %1747 = vmatpush3.msra.mxu1 %v2216_v21  ;;  %1700 = vmatpush3.msra.mxu0 %v2191_v15 }
  0x72   :  { %1748 = vmatprep.subr.mxu1 %v2112_v0  ;;  %1701 = vmatprep.subr.mxu0 %v2112_v0 }
  0x73   :  { %1749 = vmatpush3.msra.mxu1 %v2220_v22  ;;  %1702 = vmatpush3.msra.mxu0 %v2196_v16 }
  0x74   :  { %1750 = vmatprep.subr.mxu1 %v2112_v0  ;;  %1703 = vmatprep.subr.mxu0 %v2112_v0 }
  0x75   :  { %1751 = vmatpush3.msra.mxu1 %v2224_v23  ;;  %1704 = vmatpush3.msra.mxu0 %v2200_v17 }
  0x76   :  { %1790 = vmatprep.subr.mxu1 %v2112_v0  ;;  %1705 = vmatprep.subr.mxu0 %v2112_v0 }
  0x77   :  { %1706 = vmatpush3.msra.mxu0 %v2204_v18 }
  0x78   :  { %1707 = vmatprep.subr.mxu0 %v2112_v0 }
  0x79   :  { %1708 = vmatpush3.msra.mxu0 %v2208_v19 }
  0x7a   :  { %1709 = vmatprep.subr.mxu0 %v2112_v0 }
  0x7b   :  { %1710 = vmatpush3.msra.mxu0 %v2212_v20 }
  0x7c   :  { %1711 = vmatprep.subr.mxu0 %v2112_v0 }
  0x7d   :  { %1712 = vmatpush3.msra.mxu0 %v2216_v21 }
  0x7e   :  { %1713 = vmatprep.subr.mxu0 %v2112_v0 }
  0x7f   :  { %1714 = vmatpush3.msra.mxu0 %v2220_v22 }
  0x80   :  { %1715 = vmatprep.subr.mxu0 %v2112_v0 }
  0x81   :  { %1716 = vmatpush3.msra.mxu0 %v2224_v23 }
  0x82   :  { %1755 = vmatprep.subr.mxu0 %v2112_v0 }
  0xfe   :  { %v219_v24 = vpop.f32.mrf.mxu0 }
 0x100   :  { %v221_v8 = vpop.f32.mrf.mxu0 }
 0x106   :  { %v2363_v10 = vpop.f32.mrf.mxu0 }
 0x108   :  { %v2365_v11 = vpop.f32.mrf.mxu0 }
 0x10e   :  { %v2367_v13 = vpop.f32.mrf.mxu0 }
 0x116   :  { %v574_v25 = vpop.f32.mrf.mxu1 }
 0x117   :  { %v575_v26 = vadd.f32 %v574_v25, %v219_v24  ;;  %v2369_v24 = vpop.f32.mrf.mxu0 }
 0x118   :  { %v1684_v27 = vpop.f32.mrf.mxu1 }
 0x119   :  { %585 = vrot.lane.b32.xlu0 %v575_v26, %s2114_s2  ;;  %v1498_v28 = vmul.f32 -1.442695, %v575_v26  ;;  %v2371_v25 = vpop.f32.mrf.mxu0 }
 0x11b   :  { %1946 = vpow2.f32 %v1498_v28 }
 0x128   :  { %v1947_v29 = vpop.eup %1946 }
 0x129   :  { %v581_v30 = vadd.f32 1.0, %v1947_v29 }
 0x12b   :  { %1948 = vrcp.f32 %v581_v30 }
 0x138   :  { %v1949_v31 = vpop.eup %1948 }
 0x18b   :  { %v586_v32 = vpop.permute.xlu0 %585 }
 0x18c   :  { %v588_v33 = vmul.f32 %v1949_v31, %v586_v32 }
 0x18e   :  { %590 = vrot.lane.b32.xlu0 %v588_v33, %s2115_s3 }
 0x200   :  { %v591_v34 = vpop.permute.xlu0 %590 }
 0x201   :  { %v593_v35 = vadd.f32 %v591_v34, %v575_v26  ;;  %v2373_v26 = vpop.f32.mrf.mxu0 }
 0x203   :  { %1950 = vtanh.f32 %v593_v35  ;;  %v2375_v27 = vpop.f32.mrf.mxu0 }
 0x205   :  { %v2377_v28 = vpop.f32.mrf.mxu0 }
 0x210   :  { %v2267_v36 = vpop.eup %1950 }
 0x211   :  { %v595_v37 = vsub.f32 0.0, %v2267_v36 }
 0x213   :  { %597 = vrot.lane.b32.xlu1 %v595_v37, %s2114_s2 }
 0x285   :  { %v598_v48 = vpop.permute.xlu1 %597 }
 0x286   :  { %v600_v50 = vmul.f32 %v1949_v31, %v598_v48 }
 0x288   :  { %602 = vrot.lane.b32.xlu1 %v600_v50, %s2114_s2 }
 0x2fa   :  { %v603_v5 = vpop.permute.xlu1 %602 }
 0x2fb   :  { %v605_v6 = vadd.f32 %v2267_v36, %v603_v5 }
 0x2fd   :  { %607 = vrot.lane.b32.xlu0 %v605_v6, %s2116_s13 }
 0x36f   :  { %v608_v7 = vpop.permute.xlu0 %607 }
 0x370   :  { %1718 = vmatmul.mubr.msk.f32.vlgmr.msra.gmra.mxu0 %vm610_vm3, %v608_v7  ;;  %v611_v41 = vsel %vm610_vm3, %v608_v7, 0.0 }
 0x371   :  { %1756 = vmatpush3.msra.mxu0 %v2159_v1  ;;  %1787 = vmatprep.mubr.msk.f32.mxu0 %vm2113_vm0, %v2112_v0 }
 0x372   :  { %1757 = vmatprep.subr.mxu0 %v2112_v0 }
 0x373   :  { %1758 = vmatpush3.msra.mxu0 %v2161_v2 }
 0x374   :  { %1759 = vmatprep.subr.mxu0 %v2112_v0 }
 0x375   :  { %1760 = vmatpush3.msra.mxu0 %v2165_v3 }
 0x376   :  { %1761 = vmatprep.subr.mxu0 %v2112_v0 }
 0x377   :  { %1762 = vmatpush3.msra.mxu0 %v2169_v4 }
 0x378   :  { %1763 = vmatprep.subr.mxu0 %v2112_v0 }
 0x379   :  { %1764 = vmatpush3.msra.mxu0 %v2174_v9 }
 0x37a   :  { %1765 = vmatprep.subr.mxu0 %v2112_v0 }
 0x37b   :  { %1766 = vmatpush3.msra.mxu0 %v2179_v12 }
 0x37c   :  { %1767 = vmatprep.subr.mxu0 %v2112_v0 }
 0x37d   :  { %1768 = vmatpush3.msra.mxu0 %v2185_v14 }
 0x37e   :  { %1769 = vmatprep.subr.mxu0 %v2112_v0 }
 0x37f   :  { %1770 = vmatpush3.msra.mxu0 %v2191_v15 }
 0x380   :  { %1771 = vmatprep.subr.mxu0 %v2112_v0 }
 0x381   :  { %1772 = vmatpush3.msra.mxu0 %v2196_v16 }
 0x382   :  { %1773 = vmatprep.subr.mxu0 %v2112_v0 }
 0x383   :  { %1774 = vmatpush3.msra.mxu0 %v2200_v17 }
 0x384   :  { %1775 = vmatprep.subr.mxu0 %v2112_v0 }
 0x385   :  { %1776 = vmatpush3.msra.mxu0 %v2204_v18 }
 0x386   :  { %1777 = vmatprep.subr.mxu0 %v2112_v0 }
 0x387   :  { %1778 = vmatpush3.msra.mxu0 %v2208_v19 }
 0x388   :  { %1779 = vmatprep.subr.mxu0 %v2112_v0 }
 0x389   :  { %1780 = vmatpush3.msra.mxu0 %v2212_v20 }
 0x38a   :  { %1781 = vmatprep.subr.mxu0 %v2112_v0 }
 0x38b   :  { %1782 = vmatpush3.msra.mxu0 %v2216_v21 }
 0x38c   :  { %1783 = vmatprep.subr.mxu0 %v2112_v0 }
 0x38d   :  { %1784 = vmatpush3.msra.mxu0 %v2220_v22 }
 0x38e   :  { %1785 = vmatprep.subr.mxu0 %v2112_v0 }
 0x38f   :  { %1786 = vmatpush3.msra.mxu0 %v2224_v23 }
 0x390   :  { %1825 = vmatprep.subr.mxu0 %v2112_v0 }
 0x430   :  { %v678_v29 = vpop.f32.mrf.mxu0 }
 0x431   :  { %v679_v30 = vadd.f32 %v678_v29, %v221_v8 }
 0x432   :  { %v1719_v31 = vpop.f32.mrf.mxu0 }
 0x433   :  { %689 = vrot.lane.b32.xlu1 %v679_v30, %s2114_s2  ;;  %v1500_v32 = vmul.f32 -1.442695, %v679_v30 }
 0x435   :  { %1952 = vpow2.f32 %v1500_v32 }
 0x442   :  { %v1953_v33 = vpop.eup %1952 }
 0x443   :  { %v685_v34 = vadd.f32 1.0, %v1953_v33 }
 0x445   :  { %1954 = vrcp.f32 %v685_v34 }
 0x452   :  { %v1955_v35 = vpop.eup %1954 }
 0x4a5   :  { %v690_v36 = vpop.permute.xlu1 %689 }
 0x4a6   :  { %v692_v37 = vmul.f32 %v1955_v35, %v690_v36 }
 0x4a8   :  { %694 = vrot.lane.b32.xlu0 %v692_v37, %s2115_s3 }
 0x51a   :  { %v695_v38 = vpop.permute.xlu0 %694 }
 0x51b   :  { %v697_v39 = vadd.f32 %v695_v38, %v679_v30 }
 0x51d   :  { %1956 = vtanh.f32 %v697_v39 }
 0x52a   :  { %v1957_v40 = vpop.eup %1956 }
 0x52b   :  { %700 = vrot.lane.b32.xlu1 %v1957_v40, %s2116_s13 }
 0x59d   :  { %v701_v42 = vpop.permute.xlu1 %700 }
 0x59e   :  { %v703_v43 = vsub.f32 %v611_v41, %v701_v42 }
 0x5a0   :  { %705 = vrot.lane.b32.xlu0 %v703_v43, %s2116_s13 }
 0x612   :  { %v706_v44 = vpop.permute.xlu0 %705 }
 0x613   :  { %v708_v45 = vmul.f32 %v1955_v35, %v706_v44 }
 0x615   :  { %710 = vrot.lane.b32.xlu1 %v708_v45, %s2114_s2 }
 0x687   :  { %v711_v46 = vpop.permute.xlu1 %710 }
 0x688   :  { %v713_v47 = vadd.f32 %v1957_v40, %v711_v46 }
 0x68a   :  { %715 = vrot.lane.b32.xlu0 %v713_v47, %s2116_s13 }
 0x6fc   :  { %v716_v48 = vpop.permute.xlu0 %715 }
 0x6fd   :  { %1753 = vmatmul.mubr.msk.f32.vlgmr.msra.gmra.mxu1 %vm610_vm3, %v716_v48  ;;  %v718_v62 = vsel %vm610_vm3, %v716_v48, 0.0 }
 0x6fe   :  { %1791 = vmatpush3.msra.mxu1 %v2159_v1  ;;  %1822 = vmatprep.mubr.msk.f32.mxu1 %vm2113_vm0, %v2112_v0 }
 0x6ff   :  { %1792 = vmatprep.subr.mxu1 %v2112_v0 }
 0x700   :  { %1793 = vmatpush3.msra.mxu1 %v2161_v2 }
 0x701   :  { %1794 = vmatprep.subr.mxu1 %v2112_v0 }
 0x702   :  { %1795 = vmatpush3.msra.mxu1 %v2165_v3 }
 0x703   :  { %1796 = vmatprep.subr.mxu1 %v2112_v0 }
 0x704   :  { %1797 = vmatpush3.msra.mxu1 %v2169_v4 }
 0x705   :  { %1798 = vmatprep.subr.mxu1 %v2112_v0 }
 0x706   :  { %1799 = vmatpush3.msra.mxu1 %v2174_v9 }
 0x707   :  { %1800 = vmatprep.subr.mxu1 %v2112_v0 }
 0x708   :  { %1801 = vmatpush3.msra.mxu1 %v2179_v12 }
 0x709   :  { %1802 = vmatprep.subr.mxu1 %v2112_v0 }
 0x70a   :  { %1803 = vmatpush3.msra.mxu1 %v2185_v14 }
 0x70b   :  { %1804 = vmatprep.subr.mxu1 %v2112_v0 }
 0x70c   :  { %1805 = vmatpush3.msra.mxu1 %v2191_v15 }
 0x70d   :  { %1806 = vmatprep.subr.mxu1 %v2112_v0 }
 0x70e   :  { %1807 = vmatpush3.msra.mxu1 %v2196_v16 }
 0x70f   :  { %1808 = vmatprep.subr.mxu1 %v2112_v0 }
 0x710   :  { %1809 = vmatpush3.msra.mxu1 %v2200_v17 }
 0x711   :  { %1810 = vmatprep.subr.mxu1 %v2112_v0 }
 0x712   :  { %1811 = vmatpush3.msra.mxu1 %v2204_v18 }
 0x713   :  { %1812 = vmatprep.subr.mxu1 %v2112_v0 }
 0x714   :  { %1813 = vmatpush3.msra.mxu1 %v2208_v19 }
 0x715   :  { %1814 = vmatprep.subr.mxu1 %v2112_v0 }
 0x716   :  { %1815 = vmatpush3.msra.mxu1 %v2212_v20 }
 0x717   :  { %1816 = vmatprep.subr.mxu1 %v2112_v0 }
 0x718   :  { %1817 = vmatpush3.msra.mxu1 %v2216_v21 }
 0x719   :  { %1818 = vmatprep.subr.mxu1 %v2112_v0 }
 0x71a   :  { %1819 = vmatpush3.msra.mxu1 %v2220_v22 }
 0x71b   :  { %1820 = vmatprep.subr.mxu1 %v2112_v0 }
 0x71c   :  { %1821 = vmatpush3.msra.mxu1 %v2224_v23 }
 0x71d   :  { %1860 = vmatprep.subr.mxu1 %v2112_v0 }
 0x7bd   :  { %v785_v49 = vpop.f32.mrf.mxu1 }
 0x7be   :  { %v786_v50 = vadd.f32 %v785_v49, %v2363_v10 }
 0x7bf   :  { %v1754_v51 = vpop.f32.mrf.mxu1 }
 0x7c0   :  { %796 = vrot.lane.b32.xlu1 %v786_v50, %s2114_s2  ;;  %v1502_v52 = vmul.f32 -1.442695, %v786_v50 }
 0x7c2   :  { %1958 = vpow2.f32 %v1502_v52 }
 0x7cf   :  { %v1959_v53 = vpop.eup %1958 }
 0x7d0   :  { %v792_v54 = vadd.f32 1.0, %v1959_v53 }
 0x7d2   :  { %1960 = vrcp.f32 %v792_v54 }
 0x7df   :  { %v1961_v55 = vpop.eup %1960 }
 0x832   :  { %v797_v56 = vpop.permute.xlu1 %796 }
 0x833   :  { %v799_v57 = vmul.f32 %v1961_v55, %v797_v56 }
 0x835   :  { %801 = vrot.lane.b32.xlu0 %v799_v57, %s2115_s3 }
 0x8a7   :  { %v802_v58 = vpop.permute.xlu0 %801 }
 0x8a8   :  { %v804_v59 = vadd.f32 %v802_v58, %v786_v50 }
 0x8aa   :  { %1962 = vtanh.f32 %v804_v59 }
 0x8b7   :  { %v1963_v60 = vpop.eup %1962 }
 0x8b8   :  { %807 = vrot.lane.b32.xlu1 %v1963_v60, %s2116_s13 }
 0x92a   :  { %v808_v61 = vpop.permute.xlu1 %807 }
 0x92b   :  { %v810_v63 = vsub.f32 %v718_v62, %v808_v61 }
 0x92d   :  { %812 = vrot.lane.b32.xlu0 %v810_v63, %s2116_s13 }
 0x99f   :  { %v813_v5 = vpop.permute.xlu0 %812 }
 0x9a0   :  { %v815_v6 = vmul.f32 %v1961_v55, %v813_v5 }
 0x9a2   :  { %817 = vrot.lane.b32.xlu1 %v815_v6, %s2114_s2 }
 0xa14   :  { %v818_v7 = vpop.permute.xlu1 %817 }
 0xa15   :  { %v820_v8 = vadd.f32 %v1963_v60, %v818_v7 }
 0xa17   :  { %822 = vrot.lane.b32.xlu0 %v820_v8, %s2116_s13 }
 0xa89   :  { %v823_v10 = vpop.permute.xlu0 %822 }
 0xa8a   :  { %1788 = vmatmul.mubr.msk.f32.vlgmr.msra.gmra.mxu0 %vm610_vm3, %v823_v10 }
 0xa8b   :  { %1826 = vmatpush3.msra.mxu0 %v2159_v1  ;;  %1857 = vmatprep.mubr.msk.f32.mxu0 %vm2113_vm0, %v2112_v0 }
 0xa8c   :  { %1827 = vmatprep.subr.mxu0 %v2112_v0 }
 0xa8d   :  { %1828 = vmatpush3.msra.mxu0 %v2161_v2 }
 0xa8e   :  { %1829 = vmatprep.subr.mxu0 %v2112_v0 }
 0xa8f   :  { %1830 = vmatpush3.msra.mxu0 %v2165_v3 }
 0xa90   :  { %1831 = vmatprep.subr.mxu0 %v2112_v0 }
 0xa91   :  { %1832 = vmatpush3.msra.mxu0 %v2169_v4 }
 0xa92   :  { %1833 = vmatprep.subr.mxu0 %v2112_v0 }
 0xa93   :  { %1834 = vmatpush3.msra.mxu0 %v2174_v9 }
 0xa94   :  { %1835 = vmatprep.subr.mxu0 %v2112_v0 }
 0xa95   :  { %1836 = vmatpush3.msra.mxu0 %v2179_v12 }
 0xa96   :  { %1837 = vmatprep.subr.mxu0 %v2112_v0 }
 0xa97   :  { %1838 = vmatpush3.msra.mxu0 %v2185_v14 }
 0xa98   :  { %1839 = vmatprep.subr.mxu0 %v2112_v0 }
 0xa99   :  { %1840 = vmatpush3.msra.mxu0 %v2191_v15 }
 0xa9a   :  { %1841 = vmatprep.subr.mxu0 %v2112_v0 }
 0xa9b   :  { %1842 = vmatpush3.msra.mxu0 %v2196_v16 }
 0xa9c   :  { %1843 = vmatprep.subr.mxu0 %v2112_v0 }
 0xa9d   :  { %1844 = vmatpush3.msra.mxu0 %v2200_v17 }
 0xa9e   :  { %1845 = vmatprep.subr.mxu0 %v2112_v0 }
 0xa9f   :  { %1846 = vmatpush3.msra.mxu0 %v2204_v18 }
 0xaa0   :  { %1847 = vmatprep.subr.mxu0 %v2112_v0 }
 0xaa1   :  { %1848 = vmatpush3.msra.mxu0 %v2208_v19 }
 0xaa2   :  { %1849 = vmatprep.subr.mxu0 %v2112_v0 }
 0xaa3   :  { %1850 = vmatpush3.msra.mxu0 %v2212_v20 }
 0xaa4   :  { %1851 = vmatprep.subr.mxu0 %v2112_v0 }
 0xaa5   :  { %1852 = vmatpush3.msra.mxu0 %v2216_v21 }
 0xaa6   :  { %1853 = vmatprep.subr.mxu0 %v2112_v0 }
 0xaa7   :  { %1854 = vmatpush3.msra.mxu0 %v2220_v22 }
 0xaa8   :  { %1855 = vmatprep.subr.mxu0 %v2112_v0 }
 0xaa9   :  { %1856 = vmatpush3.msra.mxu0 %v2224_v23 }
 0xaaa   :  { %1895 = vmatprep.subr.mxu0 %v2112_v0 }
 0xb4a   :  { %v892_v29 = vpop.f32.mrf.mxu0 }
 0xb4b   :  { %v893_v30 = vadd.f32 %v892_v29, %v2365_v11  ;;  %v825_v11 = vsel %vm610_vm3, %v823_v10, 0.0 }
 0xb4c   :  { %v1789_v31 = vpop.f32.mrf.mxu0 }
 0xb4d   :  { %903 = vrot.lane.b32.xlu1 %v893_v30, %s2114_s2  ;;  %v1504_v32 = vmul.f32 -1.442695, %v893_v30 }
 0xb4f   :  { %1964 = vpow2.f32 %v1504_v32 }
 0xb5c   :  { %v1965_v33 = vpop.eup %1964 }
 0xb5d   :  { %v899_v34 = vadd.f32 1.0, %v1965_v33 }
 0xb5f   :  { %1966 = vrcp.f32 %v899_v34 }
 0xb6c   :  { %v1967_v35 = vpop.eup %1966 }
 0xbbf   :  { %v904_v36 = vpop.permute.xlu1 %903 }
 0xbc0   :  { %v906_v37 = vmul.f32 %v1967_v35, %v904_v36 }
 0xbc2   :  { %908 = vrot.lane.b32.xlu0 %v906_v37, %s2115_s3 }
 0xc34   :  { %v909_v38 = vpop.permute.xlu0 %908 }
 0xc35   :  { %v911_v39 = vadd.f32 %v909_v38, %v893_v30 }
 0xc37   :  { %1968 = vtanh.f32 %v911_v39 }
 0xc44   :  { %v1969_v40 = vpop.eup %1968 }
 0xc45   :  { %914 = vrot.lane.b32.xlu1 %v1969_v40, %s2116_s13 }
 0xcb7   :  { %v915_v41 = vpop.permute.xlu1 %914 }
 0xcb8   :  { %v917_v42 = vsub.f32 %v825_v11, %v915_v41 }
 0xcba   :  { %919 = vrot.lane.b32.xlu0 %v917_v42, %s2116_s13 }
 0xd2c   :  { %v920_v43 = vpop.permute.xlu0 %919 }
 0xd2d   :  { %v922_v44 = vmul.f32 %v1967_v35, %v920_v43 }
 0xd2f   :  { %924 = vrot.lane.b32.xlu1 %v922_v44, %s2114_s2 }
 0xda1   :  { %v925_v45 = vpop.permute.xlu1 %924 }
 0xda2   :  { %v927_v46 = vadd.f32 %v1969_v40, %v925_v45 }
 0xda4   :  { %929 = vrot.lane.b32.xlu0 %v927_v46, %s2116_s13 }
 0xe16   :  { %v930_v47 = vpop.permute.xlu0 %929 }
 0xe17   :  { %1823 = vmatmul.mubr.msk.f32.vlgmr.msra.gmra.mxu1 %vm610_vm3, %v930_v47  ;;  %v932_v60 = vsel %vm610_vm3, %v930_v47, 0.0 }
 0xe18   :  { %1861 = vmatpush3.msra.mxu1 %v2159_v1  ;;  %1892 = vmatprep.mubr.msk.f32.mxu1 %vm2113_vm0, %v2112_v0 }
 0xe19   :  { %1862 = vmatprep.subr.mxu1 %v2112_v0 }
 0xe1a   :  { %1863 = vmatpush3.msra.mxu1 %v2161_v2 }
 0xe1b   :  { %1864 = vmatprep.subr.mxu1 %v2112_v0 }
 0xe1c   :  { %1865 = vmatpush3.msra.mxu1 %v2165_v3 }
 0xe1d   :  { %1866 = vmatprep.subr.mxu1 %v2112_v0 }
 0xe1e   :  { %1867 = vmatpush3.msra.mxu1 %v2169_v4 }
 0xe1f   :  { %1868 = vmatprep.subr.mxu1 %v2112_v0 }
 0xe20   :  { %1869 = vmatpush3.msra.mxu1 %v2174_v9 }
 0xe21   :  { %1870 = vmatprep.subr.mxu1 %v2112_v0 }
 0xe22   :  { %1871 = vmatpush3.msra.mxu1 %v2179_v12 }
 0xe23   :  { %1872 = vmatprep.subr.mxu1 %v2112_v0 }
 0xe24   :  { %1873 = vmatpush3.msra.mxu1 %v2185_v14 }
 0xe25   :  { %1874 = vmatprep.subr.mxu1 %v2112_v0 }
 0xe26   :  { %1875 = vmatpush3.msra.mxu1 %v2191_v15 }
 0xe27   :  { %1876 = vmatprep.subr.mxu1 %v2112_v0 }
 0xe28   :  { %1877 = vmatpush3.msra.mxu1 %v2196_v16 }
 0xe29   :  { %1878 = vmatprep.subr.mxu1 %v2112_v0 }
 0xe2a   :  { %1879 = vmatpush3.msra.mxu1 %v2200_v17 }
 0xe2b   :  { %1880 = vmatprep.subr.mxu1 %v2112_v0 }
 0xe2c   :  { %1881 = vmatpush3.msra.mxu1 %v2204_v18 }
 0xe2d   :  { %1882 = vmatprep.subr.mxu1 %v2112_v0 }
 0xe2e   :  { %1883 = vmatpush3.msra.mxu1 %v2208_v19 }
 0xe2f   :  { %1884 = vmatprep.subr.mxu1 %v2112_v0 }
 0xe30   :  { %1885 = vmatpush3.msra.mxu1 %v2212_v20 }
 0xe31   :  { %1886 = vmatprep.subr.mxu1 %v2112_v0 }
 0xe32   :  { %1887 = vmatpush3.msra.mxu1 %v2216_v21 }
 0xe33   :  { %1888 = vmatprep.subr.mxu1 %v2112_v0 }
 0xe34   :  { %1889 = vmatpush3.msra.mxu1 %v2220_v22 }
 0xe35   :  { %1890 = vmatprep.subr.mxu1 %v2112_v0 }
 0xe36   :  { %1891 = vmatpush3.msra.mxu1 %v2224_v23 }
 0xed7   :  { %v999_v48 = vpop.f32.mrf.mxu1 }
 0xed8   :  { %v1000_v49 = vadd.f32 %v999_v48, %v2367_v13 }
 0xed9   :  { %v1824_v50 = vpop.f32.mrf.mxu1 }
 0xeda   :  { %1010 = vrot.lane.b32.xlu1 %v1000_v49, %s2114_s2  ;;  %v1506_v51 = vmul.f32 -1.442695, %v1000_v49 }
 0xedc   :  { %1970 = vpow2.f32 %v1506_v51 }
 0xee9   :  { %v1971_v52 = vpop.eup %1970 }
 0xeea   :  { %v1006_v53 = vadd.f32 1.0, %v1971_v52 }
 0xeec   :  { %1972 = vrcp.f32 %v1006_v53 }
 0xef9   :  { %v1973_v54 = vpop.eup %1972 }
 0xf4c   :  { %v1011_v55 = vpop.permute.xlu1 %1010 }
 0xf4d   :  { %v1013_v56 = vmul.f32 %v1973_v54, %v1011_v55 }
 0xf4f   :  { %1015 = vrot.lane.b32.xlu0 %v1013_v56, %s2115_s3 }
 0xfc1   :  { %v1016_v57 = vpop.permute.xlu0 %1015 }
 0xfc2   :  { %v1018_v58 = vadd.f32 %v1016_v57, %v1000_v49 }
 0xfc4   :  { %1974 = vtanh.f32 %v1018_v58 }
 0xfd1   :  { %v1975_v59 = vpop.eup %1974 }
 0xfd2   :  { %1021 = vrot.lane.b32.xlu1 %v1975_v59, %s2116_s13 }
0x1044   :  { %v1022_v13 = vpop.permute.xlu1 %1021 }
0x1045   :  { %v1024_v61 = vsub.f32 %v932_v60, %v1022_v13  ;;  %v1392_v60 = vld [vmem:[#allocation8 + $0xf8] sm:$0xff] }
0x1046   :  { %1393 = vmatprep.subr.mxu1 %v1392_v60 }
0x1047   :  { %1026 = vrot.lane.b32.xlu0 %v1024_v61, %s2116_s13  ;;  %v1391_v61 = vld [vmem:[#allocation8 + $0xf0] sm:$0xff] }
0x10b9   :  { %v1027_v62 = vpop.permute.xlu0 %1026 }
0x10ba   :  { %v1029_v63 = vmul.f32 %v1973_v54, %v1027_v62  ;;  %v1390_v62 = vld [vmem:[#allocation8 + $0xe8] sm:$0xff] }
0x10bc   :  { %1031 = vrot.lane.b32.xlu1 %v1029_v63, %s2114_s2  ;;  %v1389_v63 = vld [vmem:[#allocation8 + $0xe0] sm:$0xff] }
0x112e   :  { %v1032_v5 = vpop.permute.xlu1 %1031 }
0x112f   :  { %v1034_v6 = vadd.f32 %v1975_v59, %v1032_v5  ;;  %v1388_v5 = vld [vmem:[#allocation8 + $0xd8] sm:$0xff] }
0x1131   :  { %1036 = vrot.lane.b32.xlu0 %v1034_v6, %s2116_s13  ;;  %v1387_v6 = vld [vmem:[#allocation8 + $0xd0] sm:$0xff] }
0x11a3   :  { %v1037_v7 = vpop.permute.xlu0 %1036 }
0x11a4   :  { %1858 = vmatmul.mubr.msk.f32.vlgmr.msra.gmra.mxu0 %vm610_vm3, %v1037_v7 }
0x11a5   :  { %1896 = vmatpush3.msra.mxu0 %v2159_v1  ;;  %1927 = vmatprep.mubr.msk.f32.mxu0 %vm2113_vm0, %v2112_v0 }
0x11a6   :  { %1897 = vmatprep.subr.mxu0 %v2112_v0 }
0x11a7   :  { %1898 = vmatpush3.msra.mxu0 %v2161_v2 }
0x11a8   :  { %1899 = vmatprep.subr.mxu0 %v2112_v0 }
0x11a9   :  { %1900 = vmatpush3.msra.mxu0 %v2165_v3 }
0x11aa   :  { %1901 = vmatprep.subr.mxu0 %v2112_v0 }
0x11ab   :  { %1902 = vmatpush3.msra.mxu0 %v2169_v4 }
0x11ac   :  { %1903 = vmatprep.subr.mxu0 %v2112_v0 }
0x11ad   :  { %1904 = vmatpush3.msra.mxu0 %v2174_v9 }
0x11ae   :  { %1905 = vmatprep.subr.mxu0 %v2112_v0 }
0x11af   :  { %1906 = vmatpush3.msra.mxu0 %v2179_v12 }
0x11b0   :  { %1907 = vmatprep.subr.mxu0 %v2112_v0 }
0x11b1   :  { %1908 = vmatpush3.msra.mxu0 %v2185_v14 }
0x11b2   :  { %1909 = vmatprep.subr.mxu0 %v2112_v0 }
0x11b3   :  { %1910 = vmatpush3.msra.mxu0 %v2191_v15 }
0x11b4   :  { %1911 = vmatprep.subr.mxu0 %v2112_v0 }
0x11b5   :  { %1912 = vmatpush3.msra.mxu0 %v2196_v16 }
0x11b6   :  { %1913 = vmatprep.subr.mxu0 %v2112_v0 }
0x11b7   :  { %1914 = vmatpush3.msra.mxu0 %v2200_v17 }
0x11b8   :  { %1915 = vmatprep.subr.mxu0 %v2112_v0 }
0x11b9   :  { %1916 = vmatpush3.msra.mxu0 %v2204_v18 }
0x11ba   :  { %1917 = vmatprep.subr.mxu0 %v2112_v0 }
0x11bb   :  { %1918 = vmatpush3.msra.mxu0 %v2208_v19 }
0x11bc   :  { %1919 = vmatprep.subr.mxu0 %v2112_v0 }
0x11bd   :  { %1920 = vmatpush3.msra.mxu0 %v2212_v20  ;;  %v1039_v20 = vsel %vm610_vm3, %v1037_v7, 0.0  ;;  %v1386_v7 = vld [vmem:[#allocation8 + $0xc8] sm:$0xff] }
0x11be   :  { %1921 = vmatprep.subr.mxu0 %v2112_v0 }
0x11bf   :  { %1922 = vmatpush3.msra.mxu0 %v2216_v21 }
0x11c0   :  { %1923 = vmatprep.subr.mxu0 %v2112_v0 }
0x11c1   :  { %1924 = vmatpush3.msra.mxu0 %v2220_v22 }
0x11c2   :  { %1925 = vmatprep.subr.mxu0 %v2112_v0 }
0x11c3   :  { %1926 = vmatpush3.msra.mxu0 %v2224_v23 }
0x1264   :  { %v1106_v1 = vpop.f32.mrf.mxu0 }
0x1265   :  { %v1107_v2 = vadd.f32 %v1106_v1, %v2369_v24  ;;  %v1385_v1 = vld [vmem:[#allocation8 + $0xc0] sm:$0xff] }
0x1266   :  { %v1859_v3 = vpop.f32.mrf.mxu0 }
0x1267   :  { %1117 = vrot.lane.b32.xlu1 %v1107_v2, %s2114_s2  ;;  %v1508_v4 = vmul.f32 -1.442695, %v1107_v2  ;;  %v1383_v3 = vld [vmem:[#allocation8 + $0xb0] sm:$0xff] }
0x1269   :  { %1976 = vpow2.f32 %v1508_v4 }
0x1276   :  { %v1977_v9 = vpop.eup %1976 }
0x1277   :  { %v1113_v12 = vadd.f32 1.0, %v1977_v9  ;;  %v1382_v9 = vld [vmem:[#allocation8 + $0xa8] sm:$0xff] }
0x1279   :  { %1978 = vrcp.f32 %v1113_v12 }
0x1286   :  { %v1979_v14 = vpop.eup %1978 }
0x12d9   :  { %v1118_v15 = vpop.permute.xlu1 %1117 }
0x12da   :  { %v1120_v16 = vmul.f32 %v1979_v14, %v1118_v15  ;;  %v1380_v15 = vld [vmem:[#allocation8 + $0x98] sm:$0xff] }
0x12dc   :  { %1122 = vrot.lane.b32.xlu0 %v1120_v16, %s2115_s3  ;;  %v1379_v16 = vld [vmem:[#allocation8 + $0x90] sm:$0xff] }
0x134e   :  { %v1123_v17 = vpop.permute.xlu0 %1122 }
0x134f   :  { %v1125_v18 = vadd.f32 %v1123_v17, %v1107_v2  ;;  %v1384_v2 = vld [vmem:[#allocation8 + $0xb8] sm:$0xff]  ;;  %v1378_v17 = vld [vmem:[#allocation8 + $0x88] sm:$0xff] }
0x1351   :  { %1980 = vtanh.f32 %v1125_v18  ;;  %v1377_v18 = vld [vmem:[#allocation8 + $0x80] sm:$0xff] }
0x135e   :  { %v1981_v19 = vpop.eup %1980 }
0x135f   :  { %1128 = vrot.lane.b32.xlu1 %v1981_v19, %s2116_s13 }
0x13d1   :  { %v1129_v21 = vpop.permute.xlu1 %1128 }
0x13d2   :  { %v1131_v22 = vsub.f32 %v1039_v20, %v1129_v21  ;;  %v1375_v20 = vld [vmem:[#allocation8 + $0x70] sm:$0xff]  ;;  %v1374_v21 = vld [vmem:[#allocation8 + $0x68] sm:$0xff] }
0x13d4   :  { %1133 = vrot.lane.b32.xlu0 %v1131_v22, %s2116_s13  ;;  %v1373_v22 = vld [vmem:[#allocation8 + $0x60] sm:$0xff] }
0x1446   :  { %v1134_v23 = vpop.permute.xlu0 %1133 }
0x1447   :  { %v1136_v24 = vmul.f32 %v1979_v14, %v1134_v23  ;;  %v1381_v14 = vld [vmem:[#allocation8 + $0xa0] sm:$0xff]  ;;  %v1372_v23 = vld [vmem:[#allocation8 + $0x58] sm:$0xff] }
0x1449   :  { %1138 = vrot.lane.b32.xlu1 %v1136_v24, %s2114_s2  ;;  %v1371_v24 = vld [vmem:[#allocation8 + $0x50] sm:$0xff] }
0x14bb   :  { %v1139_v8 = vpop.permute.xlu1 %1138 }
0x14bc   :  { %v1141_v10 = vadd.f32 %v1981_v19, %v1139_v8  ;;  %v1376_v19 = vld [vmem:[#allocation8 + $0x78] sm:$0xff]  ;;  %v1370_v8 = vld [vmem:[#allocation8 + $0x48] sm:$0xff] }
0x14be   :  { %1143 = vrot.lane.b32.xlu0 %v1141_v10, %s2116_s13  ;;  %v1369_v10 = vld [vmem:[#allocation8 + $0x40] sm:$0xff] }
0x1530   :  { %v1144_v29 = vpop.permute.xlu0 %1143 }
0x1531   :  { %1893 = vmatmul.mubr.msk.f32.vlgmr.msra.gmra.mxu1 %vm610_vm3, %v1144_v29  ;;  %v1146_v11 = vsel %vm610_vm3, %v1144_v29, 0.0  ;;  %v1368_v29 = vld [vmem:[#allocation8 + $0x38] sm:$0xff] }
0x1532   :  { %1457 = vmatprep.mubr.f32.mxu1 %v2112_v0  ;;  %1394 = vmatpush1.msra.mxu1 %v1391_v61 }
0x1533   :  { %1395 = vmatprep.subr.mxu1 %v1390_v62 }
0x1534   :  { %1396 = vmatpush1.msra.mxu1 %v1389_v63 }
0x1535   :  { %1397 = vmatprep.subr.mxu1 %v1388_v5 }
0x1536   :  { %1398 = vmatpush1.msra.mxu1 %v1387_v6 }
0x1537   :  { %1399 = vmatprep.subr.mxu1 %v1386_v7 }
0x1538   :  { %1400 = vmatpush1.msra.mxu1 %v1385_v1 }
0x1539   :  { %1401 = vmatprep.subr.mxu1 %v1384_v2 }
0x153a   :  { %1402 = vmatpush1.msra.mxu1 %v1383_v3 }
0x153b   :  { %1403 = vmatprep.subr.mxu1 %v1382_v9 }
0x153c   :  { %1404 = vmatpush1.msra.mxu1 %v1381_v14 }
0x153d   :  { %1405 = vmatprep.subr.mxu1 %v1380_v15 }
0x153e   :  { %1406 = vmatpush1.msra.mxu1 %v1379_v16 }
0x153f   :  { %1407 = vmatprep.subr.mxu1 %v1378_v17 }
0x1540   :  { %1408 = vmatpush1.msra.mxu1 %v1377_v18 }
0x1541   :  { %1409 = vmatprep.subr.mxu1 %v1376_v19 }
0x1542   :  { %1410 = vmatpush1.msra.mxu1 %v1375_v20 }
0x1543   :  { %1411 = vmatprep.subr.mxu1 %v1374_v21 }
0x1544   :  { %1412 = vmatpush1.msra.mxu1 %v1373_v22 }
0x1545   :  { %1413 = vmatprep.subr.mxu1 %v1372_v23 }
0x1546   :  { %1414 = vmatpush1.msra.mxu1 %v1371_v24 }
0x1547   :  { %1415 = vmatprep.subr.mxu1 %v1370_v8 }
0x1548   :  { %1416 = vmatpush1.msra.mxu1 %v1369_v10 }
0x1549   :  { %1417 = vmatprep.subr.mxu1 %v1368_v29 }
0x15f1   :  { %v1213_v30 = vpop.f32.mrf.mxu1 }
0x15f2   :  { %v1214_v31 = vadd.f32 %v1213_v30, %v2371_v25  ;;  %v1367_v30 = vld [vmem:[#allocation8 + $0x30] sm:$0xff] }
0x15f3   :  { %v1894_v32 = vpop.f32.mrf.mxu1  ;;  %1418 = vmatpush1.msra.mxu1 %v1367_v30 }
0x15f4   :  { %1224 = vrot.lane.b32.xlu1 %v1214_v31, %s2114_s2  ;;  %v1510_v33 = vmul.f32 -1.442695, %v1214_v31  ;;  %v1365_v32 = vld [vmem:[#allocation8 + $0x20] sm:$0xff] }
0x15f6   :  { %1982 = vpow2.f32 %v1510_v33  ;;  %v1364_v33 = vld [vmem:[#allocation8 + $0x18] sm:$0xff] }
0x1603   :  { %v1983_v34 = vpop.eup %1982 }
0x1604   :  { %v1220_v35 = vadd.f32 1.0, %v1983_v34  ;;  %v1363_v34 = vld [vmem:[#allocation8 + $0x10] sm:$0xff] }
0x1606   :  { %1984 = vrcp.f32 %v1220_v35  ;;  %v1362_v35 = vld [vmem:[#allocation8 + $0x8] sm:$0xff] }
0x1613   :  { %v1985_v36 = vpop.eup %1984 }
0x1666   :  { %v1225_v37 = vpop.permute.xlu1 %1224 }
0x1667   :  { %v1227_v38 = vmul.f32 %v1985_v36, %v1225_v37 }
0x1669   :  { %1229 = vrot.lane.b32.xlu0 %v1227_v38, %s2115_s3 }
0x16db   :  { %v1230_v39 = vpop.permute.xlu0 %1229 }
0x16dc   :  { %v1232_v40 = vadd.f32 %v1230_v39, %v1214_v31  ;;  %v1366_v31 = vld [vmem:[#allocation8 + $0x28] sm:$0xff] }
0x16dd   :  { %1419 = vmatprep.subr.mxu1 %v1366_v31 }
0x16de   :  { %1986 = vtanh.f32 %v1232_v40  ;;  %1420 = vmatpush1.msra.mxu1 %v1365_v32 }
0x16df   :  { %1421 = vmatprep.subr.mxu1 %v1364_v33 }
0x16e0   :  { %1422 = vmatpush1.msra.mxu1 %v1363_v34 }
0x16e1   :  { %1423 = vmatprep.subr.mxu1 %v1362_v35 }
0x16eb   :  { %v1987_v0 = vpop.eup %1986 }
0x16ec   :  { %1235 = vrot.lane.b32.xlu1 %v1987_v0, %s2116_s13 }
0x175e   :  { %v1236_v25 = vpop.permute.xlu1 %1235 }
0x175f   :  { %v1238_v41 = vsub.f32 %v1146_v11, %v1236_v25 }
0x1761   :  { %1240 = vrot.lane.b32.xlu0 %v1238_v41, %s2116_s13 }
0x17d3   :  { %v1241_v42 = vpop.permute.xlu0 %1240 }
0x17d4   :  { %v1243_v43 = vmul.f32 %v1985_v36, %v1241_v42  ;;  %v1361_v36 = vld [vmem:[#allocation8] sm:$0xff] }
0x17d5   :  { %1424 = vmatpush1.msra.mxu1 %v1361_v36 }
0x17d6   :  { %1245 = vrot.lane.b32.xlu1 %v1243_v43, %s2114_s2 }
0x1848   :  { %v1246_v44 = vpop.permute.xlu1 %1245 }
0x1849   :  { %v1248_v45 = vadd.f32 %v1987_v0, %v1246_v44 }
0x184b   :  { %1250 = vrot.lane.b32.xlu0 %v1248_v45, %s2116_s13 }
0x18bd   :  { %v1251_v46 = vpop.permute.xlu0 %1250 }
0x18be   :  { %1928 = vmatmul.mubr.msk.f32.vlgmr.msra.gmra.mxu0 %vm610_vm3, %v1251_v46 }
0x197e   :  { %v1320_v47 = vpop.f32.mrf.mxu0 }
0x197f   :  { %v1321_v48 = vadd.f32 %v1320_v47, %v2373_v26  ;;  %v1253_v26 = vsel %vm610_vm3, %v1251_v46, 0.0 }
0x1980   :  { %v1929_v49 = vpop.f32.mrf.mxu0 }
0x1981   :  { %1331 = vrot.lane.b32.xlu1 %v1321_v48, %s2114_s2  ;;  %v1512_v50 = vmul.f32 -1.442695, %v1321_v48 }
0x1983   :  { %1988 = vpow2.f32 %v1512_v50 }
0x1990   :  { %v1989_v51 = vpop.eup %1988 }
0x1991   :  { %v1327_v52 = vadd.f32 1.0, %v1989_v51 }
0x1993   :  { %1990 = vrcp.f32 %v1327_v52 }
0x19a0   :  { %v1991_v53 = vpop.eup %1990 }
0x19f3   :  { %v1332_v54 = vpop.permute.xlu1 %1331 }
0x19f4   :  { %v1334_v55 = vmul.f32 %v1991_v53, %v1332_v54 }
0x19f6   :  { %1336 = vrot.lane.b32.xlu0 %v1334_v55, %s2115_s3 }
0x1a68   :  { %v1337_v56 = vpop.permute.xlu0 %1336 }
0x1a69   :  { %v1339_v57 = vadd.f32 %v1337_v56, %v1321_v48 }
0x1a6b   :  { %1992 = vtanh.f32 %v1339_v57 }
0x1a78   :  { %v2570_v58 = vpop.eup %1992 }
0x1a79   :  { %1342 = vrot.lane.b32.xlu1 %v2570_v58, %s2116_s13 }
0x1aeb   :  { %v1343_v59 = vpop.permute.xlu1 %1342 }
0x1aec   :  { %v1345_v13 = vsub.f32 %v1253_v26, %v1343_v59 }
0x1aee   :  { %1347 = vrot.lane.b32.xlu0 %v1345_v13, %s2116_s13 }
0x1b60   :  { %v1348_v4 = vpop.permute.xlu0 %1347 }
0x1b61   :  { %v1350_v12 = vmul.f32 %v1991_v53, %v1348_v4 }
0x1b63   :  { %1352 = vrot.lane.b32.xlu1 %v1350_v12, %s2114_s2 }
0x1bd5   :  { %v1353_v37 = vpop.permute.xlu1 %1352 }
0x1bd6   :  { %v1355_v38 = vadd.f32 %v2570_v58, %v1353_v37 }
0x1bd8   :  { %1357 = vrot.lane.b32.xlu0 %v1355_v38, %s2116_s13 }
0x1c4a   :  { %v1358_v39 = vpop.permute.xlu0 %1357 }
0x1c4b   :  { %1513 = vmatmul.mubr.msk.f32.vlgmr.msra.gmra.mxu1 %vm610_vm3, %v1358_v39 }
0x1d0b   :  { %v1459_v40 = vpop.f32.mrf.mxu1 }
0x1d0c   :  { %v1460_v25 = vadd.f32 %v1459_v40, %v2375_v27 }
0x1d0d   :  { %v1461_v0 = vpop.f32.mrf.mxu1 }
0x1d0e   :  { %v1462_v11 = vadd.f32 %v1461_v0, %v2377_v28 }
0x1d10   :  { %v1464_v41 = vmul.f32 %v1462_v11, %v1460_v25 }
0x1d12   :  { %1465 = vst [vmem:[#allocation10] sm:$0xff] %v1464_v41 }
0x1d13   :  { %2085 = shalt.err (!%p2082_p10)
}
0x1d14   :  { %1475 = dma.vmem_to_hbm [thread:$0]  %s1473_s15, 128, %s2589_s4, [#allocation4]  }
0x1d15   :  { %2100 = dma.done.wait [#allocation4], 128  }
0x1d16   :  { %2101 = vsyncadd [#allocation4], 4294967168 }
0x1d17   :  { %1479 = vsyncpa [#allocation3], 1 }
0x1d18   :  { %1480 = vsyncpa [#allocation6], 1 }
0x1d19   :  { %1481 = vsyncpa [#allocation9], 1 }
0x1d1a   :  { %1482 = vsyncpa [#allocation4], 1 }

</bundles_post_ra>
